<compile_context>
chip_gen: v5e
topology: v5e:2x2
jax: 0.10.0
libtpu: 0.0.40
codegen_flags: <defaults>
</compile_context>

<pallas_src>
import functools

import jax
import jax.numpy as jnp
from jax import lax
from jax.experimental import pallas as pl
from jax.experimental.pallas import tpu as pltpu


DTYPE = jnp.bfloat16                  # storage / matmul-operand dtype


def _vmem_limit_bytes():
    """Generation-aware scoped-VMEM budget: ~75% of physical, capped at 96 MiB.

    v5e / v6e (128 MiB physical) -> 96 MiB;  v7x (64 MiB physical) -> 48 MiB.
    """
    cap = 64 * 1024 * 1024
    try:
        cap = int(getattr(pltpu.get_tpu_info(), "vmem_capacity_bytes", cap))
    except Exception:
        pass
    return min((cap * 3) // 4, 96 * 1024 * 1024)


def _ln_f32(x_f32, gamma, beta, eps):
    """LayerNorm with f32 statistics; gamma/beta broadcast over leading dims."""
    mean = jnp.mean(x_f32, axis=-1, keepdims=True)
    var = jnp.mean(jnp.square(x_f32 - mean), axis=-1, keepdims=True)
    y = (x_f32 - mean) * lax.rsqrt(var + eps)
    return y * gamma.astype(jnp.float32) + beta.astype(jnp.float32)


# --------------------------- fused encoder stack -----------------------------

def _encoder_stack_kernel(
        tok_ref, pos_ref, eg_ref, eb_ref, mask_ref,
        wqkv_ref, bqkv_ref, wo_ref, bo_ref, ln1_g_ref, ln1_b_ref,
        w1_ref, b1_ref, w2_ref, b2_ref, ln2_g_ref, ln2_b_ref,
        o_ref, h_scr, *, num_heads, d_head, eps):
    l = pl.program_id(1)
    H = num_heads * d_head
    S = tok_ref.shape[1]
    cdt = tok_ref.dtype                     # bf16 matmul-operand dtype

    # ---- layer 0 only: fused (tok + pos) embedding LayerNorm -> carry buffer.
    @pl.when(l == 0)
    def _():
        x0 = tok_ref[0].astype(jnp.float32) + pos_ref[...].astype(jnp.float32)
        h_scr[0] = _ln_f32(x0, eg_ref[...], eb_ref[...], eps)

    x_f32 = h_scr[0]                        # (S, H) carried activation, f32
    x = x_f32.astype(cdt)

    # ---- fused QKV projection: one (S,H)@(H,3H) matmul, f32 accumulation.
    # (1/sqrt(d_head) is pre-folded into the Q columns of wqkv/bqkv at init.)
    qkv = jnp.dot(x, wqkv_ref[0], preferred_element_type=jnp.float32)
    qkv = qkv + bqkv_ref[0].astype(jnp.float32)                  # (S, 3H)

    # ---- single head-split relayout (done once, not inside a compute loop).
    def split_heads(x2d):                   # (S, H) -> (nh, S, d_head)
        return jnp.stack(
            [x2d[:, h * d_head:(h + 1) * d_head] for h in range(num_heads)],
            axis=0)

    q = split_heads(qkv[:, :H].astype(cdt))
    k = split_heads(qkv[:, H:2 * H].astype(cdt))
    v = split_heads(qkv[:, 2 * H:].astype(cdt))

    # ---- additive mask bias, built in-kernel once per step (no HBM tensor).
    # finite -1e9 (not -inf) so fully-masked rows stay NaN-free.
    bias = (1.0 - mask_ref[0].astype(jnp.float32)) * (-1e9)      # (1, S)

    # ---- attention, batched over heads (one dot_general per matmul).
    s = jnp.einsum('nid,njd->nij', q, k,
                   preferred_element_type=jnp.float32)           # (nh, S, S)
    s = s + bias                                                 # bcast (1,1,S)
    s = s - jnp.max(s, axis=-1, keepdims=True)
    p = jnp.exp(s)                                               # f32 softmax
    p = p * pl.reciprocal(jnp.sum(p, axis=-1, keepdims=True), approx=True)
    ctx = jnp.einsum('nij,njd->nid', p.astype(cdt), v,
                     preferred_element_type=jnp.float32)         # (nh, S, dh)

    # ---- column-concat of heads + ONE output-projection matmul (K = H).
    ctx_cat = jnp.concatenate([ctx[h] for h in range(num_heads)], axis=-1)
    attn = jnp.dot(ctx_cat.astype(cdt), wo_ref[0],
                   preferred_element_type=jnp.float32)           # (S, H)
    attn = attn + bo_ref[0].astype(jnp.float32)

    # ---- residual + LayerNorm 1 (f32 statistics).
    h1 = _ln_f32(x_f32 + attn, ln1_g_ref[0], ln1_b_ref[0], eps)

    # ---- FFN: fc1 + ReLU + fc2; the (S,4H) intermediate never leaves VMEM.
    h1c = h1.astype(cdt)
    ff = jnp.dot(h1c, w1_ref[0], preferred_element_type=jnp.float32)
    ff = jnp.maximum(ff + b1_ref[0].astype(jnp.float32), 0.0)
    ff = jnp.dot(ff.astype(cdt), w2_ref[0], preferred_element_type=jnp.float32)
    ff = ff + b2_ref[0].astype(jnp.float32)

    # ---- residual + LayerNorm 2 -> carry for the next layer.
    h_scr[0] = _ln_f32(h1 + ff, ln2_g_ref[0], ln2_b_ref[0], eps)

    # ---- final layer: the only HBM activation write.
    @pl.when(l == pl.num_programs(1) - 1)
    def _():
        o_ref[0] = h_scr[0].astype(o_ref.dtype)


def transformer_encoder_forward(params, config, enc_ids, enc_mask=None, eps=1e-5):
    """Matches TransformerEncoder.forward(enc_ids, enc_mask) -> (B, S, H)."""
    B, S = enc_ids.shape
    H = config["hidden_size"]
    nh = config["num_heads"]
    L = config["num_encoder_layers"]
    assert H % nh == 0
    d_head = H // nh
    assert S <= params["pos_encoding"].shape[0], "seq_len exceeds positional table"

    # nn.Embedding gather is data-dependent -> done at the JAX level.
    tok = jnp.take(params["embed_tokens"], enc_ids, axis=0)      # (B, S, H)
    pos = params["pos_encoding"][:S]                             # (S, H)

    # (B, S) mask -> (B, 1, S) float; the additive bias is built in-kernel.
    if enc_mask is None:
        mask = jnp.ones((B, 1, S), jnp.float32)
    else:
        mask = enc_mask.astype(jnp.float32).reshape(B, 1, S)

    lp = params["layers"]                                        # stacked (L, ...)
    kern = functools.partial(_encoder_stack_kernel,
                             num_heads=nh, d_head=d_head, eps=eps)

    per_b3 = lambda b, l: (b, 0, 0)     # per-batch-row blocks (constant across l)
    const2 = lambda b, l: (0, 0)        # grid-constant small params
    per_l3 = lambda b, l: (l, 0, 0)     # per-layer weight slabs (streamed over l)

    grid_spec = pltpu.PrefetchScalarGridSpec(
        num_scalar_prefetch=0,
        grid=(B, L),
        in_specs=[
            pl.BlockSpec((1, S, H), per_b3),            # tok
            pl.BlockSpec((S, H), const2),                # pos
            pl.BlockSpec((1, H), const2),                # emb LN gamma
            pl.BlockSpec((1, H), const2),                # emb LN beta
            pl.BlockSpec((1, 1, S), per_b3),             # mask
            pl.BlockSpec((1, H, 3 * H), per_l3),         # wqkv
            pl.BlockSpec((1, 1, 3 * H), per_l3),         # bqkv
            pl.BlockSpec((1, H, H), per_l3),             # wo
            pl.BlockSpec((1, 1, H), per_l3),             # bo
            pl.BlockSpec((1, 1, H), per_l3),             # ln1 gamma
            pl.BlockSpec((1, 1, H), per_l3),             # ln1 beta
            pl.BlockSpec((1, H, 4 * H), per_l3),         # w1
            pl.BlockSpec((1, 1, 4 * H), per_l3),         # b1
            pl.BlockSpec((1, 4 * H, H), per_l3),         # w2
            pl.BlockSpec((1, 1, H), per_l3),             # b2
            pl.BlockSpec((1, 1, H), per_l3),             # ln2 gamma
            pl.BlockSpec((1, 1, H), per_l3),             # ln2 beta
        ],
        out_specs=pl.BlockSpec((1, S, H), per_b3),
        scratch_shapes=[pltpu.VMEM((1, S, H), jnp.float32)],     # layer carry
    )

    return pl.pallas_call(
        kern,
        out_shape=jax.ShapeDtypeStruct((B, S, H), tok.dtype),
        grid_spec=grid_spec,
        compiler_params=pltpu.CompilerParams(
            dimension_semantics=("parallel", "arbitrary"),
            vmem_limit_bytes=_vmem_limit_bytes()),
    )(tok, pos, params["emb_ln_g"], params["emb_ln_b"], mask,
      lp["wqkv"], lp["bqkv"], lp["wo"], lp["bo"], lp["ln1_g"], lp["ln1_b"],
      lp["w1"], lp["b1"], lp["w2"], lp["b2"], lp["ln2_g"], lp["ln2_b"])


# ------------------------------- params --------------------------------------

def make_positional_encoding(hidden_size, max_len=1024):
    pos = jnp.arange(max_len, dtype=jnp.float32)[:, None]
    _2i = jnp.arange(0, hidden_size, 2, dtype=jnp.float32)
    angle = pos / (10000.0 ** (_2i / hidden_size))
    enc = jnp.zeros((max_len, hidden_size), dtype=jnp.float32)
    enc = enc.at[:, 0::2].set(jnp.sin(angle))
    enc = enc.at[:, 1::2].set(jnp.cos(angle))
    return enc.astype(DTYPE)


def init_params(config, key):
    H = config["hidden_size"]
    V = config["vocab_size"]
    L = config["num_encoder_layers"]
    nh = config["num_heads"]
    scale = (H // nh) ** (-0.5)

    def nrm(k, shape, s=0.02):
        return (s * jax.random.normal(k, shape, dtype=jnp.float32)).astype(DTYPE)

    keys = jax.random.split(key, 1 + 6 * L)
    embed = nrm(keys[0], (V, H))
    embed = embed.at[config["pad_token_id"]].set(0)   # nn.Embedding padding_idx row

    names = ["wqkv", "bqkv", "wo", "bo", "ln1_g", "ln1_b",
             "w1", "b1", "w2", "b2", "ln2_g", "ln2_b"]
    stacks = {n: [] for n in names}
    for l in range(L):
        k = keys[1 + 6 * l: 1 + 6 * (l + 1)]
        wq, wk, wv = nrm(k[0], (H, H)), nrm(k[1], (H, H)), nrm(k[2], (H, H))
        bq = bk = bv = jnp.zeros((1, H), DTYPE)
        # Fused QKV weight (in, out) = (H, 3H); 1/sqrt(d_head) folded into the
        # Q weight AND Q bias so the kernel never applies per-head scaling.
        stacks["wqkv"].append(jnp.concatenate(
            [(wq.astype(jnp.float32) * scale).astype(DTYPE), wk, wv], axis=1))
        stacks["bqkv"].append(jnp.concatenate(
            [(bq.astype(jnp.float32) * scale).astype(DTYPE), bk, bv], axis=1))
        stacks["wo"].append(nrm(k[3], (H, H)))
        stacks["bo"].append(jnp.zeros((1, H), DTYPE))
        stacks["ln1_g"].append(jnp.ones((1, H), DTYPE))
        stacks["ln1_b"].append(jnp.zeros((1, H), DTYPE))
        stacks["w1"].append(nrm(k[4], (H, 4 * H)))
        stacks["b1"].append(jnp.zeros((1, 4 * H), DTYPE))
        stacks["w2"].append(nrm(k[5], (4 * H, H)))
        stacks["b2"].append(jnp.zeros((1, H), DTYPE))
        stacks["ln2_g"].append(jnp.ones((1, H), DTYPE))
        stacks["ln2_b"].append(jnp.zeros((1, H), DTYPE))

    return {
        "embed_tokens": embed,
        "pos_encoding": make_positional_encoding(H),
        "emb_ln_g": jnp.ones((1, H), DTYPE),
        "emb_ln_b": jnp.zeros((1, H), DTYPE),
        # Per-layer weights stacked with a leading L axis -> streamed per l step.
        "layers": {n: jnp.stack(v, axis=0) for n, v in stacks.items()},
    }


# ----------------------------------- main -------------------------------------

if __name__ == "__main__":
    config = {
        "vocab_size": 100,
        "hidden_size": 32,
        "num_heads": 4,
        "num_encoder_layers": 2,
        "pad_token_id": 0,
    }
    B, S = 2, 8

    key = jax.random.PRNGKey(0)
    k_param, k_ids = jax.random.split(key)
    params = init_params(config, k_param)

    enc_ids = jax.random.randint(k_ids, (B, S), 0, config["vocab_size"], dtype=jnp.int32)
    enc_mask = jnp.ones((B, S), dtype=jnp.int32)

    hidden = transformer_encoder_forward(params, config, enc_ids, enc_mask)
    hidden = jax.block_until_ready(hidden)

    assert hidden.shape == (B, S, config["hidden_size"])
    assert bool(jnp.all(jnp.isfinite(hidden.astype(jnp.float32))))
    print("KERNEL_OK")
</pallas_src>

<mosaic_0001>
module attributes {stable_mosaic.version = 11 : i64} {
  func.func @_encoder_stack_kernel(%arg0: i32, %arg1: i32, %arg2: memref<1x8x32xbf16, #tpu.memory_space<vmem>>, %arg3: memref<8x32xbf16, #tpu.memory_space<vmem>>, %arg4: memref<1x32xbf16, #tpu.memory_space<vmem>>, %arg5: memref<1x32xbf16, #tpu.memory_space<vmem>>, %arg6: memref<1x1x8xf32, #tpu.memory_space<vmem>>, %arg7: memref<1x32x96xbf16, #tpu.memory_space<vmem>>, %arg8: memref<1x1x96xbf16, #tpu.memory_space<vmem>>, %arg9: memref<1x32x32xbf16, #tpu.memory_space<vmem>>, %arg10: memref<1x1x32xbf16, #tpu.memory_space<vmem>>, %arg11: memref<1x1x32xbf16, #tpu.memory_space<vmem>>, %arg12: memref<1x1x32xbf16, #tpu.memory_space<vmem>>, %arg13: memref<1x32x128xbf16, #tpu.memory_space<vmem>>, %arg14: memref<1x1x128xbf16, #tpu.memory_space<vmem>>, %arg15: memref<1x128x32xbf16, #tpu.memory_space<vmem>>, %arg16: memref<1x1x32xbf16, #tpu.memory_space<vmem>>, %arg17: memref<1x1x32xbf16, #tpu.memory_space<vmem>>, %arg18: memref<1x1x32xbf16, #tpu.memory_space<vmem>>, %arg19: memref<1x8x32xbf16, #tpu.memory_space<vmem>>, %arg20: memref<1x8x32xf32, #tpu.memory_space<vmem>>) attributes {dimension_semantics = [#tpu.dimension_semantics<parallel>, #tpu.dimension_semantics<arbitrary>], iteration_bounds = array<i64: 2, 2>, scalar_prefetch = 0 : i64, scratch_operands = 1 : i64, tpu.core_type = #tpu.core_type<tc>, window_params = [{transform_indices = @transform_0, window_bounds = array<i64: 1, 8, 32>}, {pipeline_mode = #tpu.pipeline_mode<synchronous>, transform_indices = @transform_1, window_bounds = array<i64: 8, 32>}, {pipeline_mode = #tpu.pipeline_mode<synchronous>, transform_indices = @transform_2, window_bounds = array<i64: 1, 32>}, {pipeline_mode = #tpu.pipeline_mode<synchronous>, transform_indices = @transform_3, window_bounds = array<i64: 1, 32>}, {transform_indices = @transform_4, window_bounds = array<i64: 1, 1, 8>}, {transform_indices = @transform_5, window_bounds = array<i64: 1, 32, 96>}, {transform_indices = @transform_6, window_bounds = array<i64: 1, 1, 96>}, {transform_indices = @transform_7, window_bounds = array<i64: 1, 32, 32>}, {transform_indices = @transform_8, window_bounds = array<i64: 1, 1, 32>}, {transform_indices = @transform_9, window_bounds = array<i64: 1, 1, 32>}, {transform_indices = @transform_10, window_bounds = array<i64: 1, 1, 32>}, {transform_indices = @transform_11, window_bounds = array<i64: 1, 32, 128>}, {transform_indices = @transform_12, window_bounds = array<i64: 1, 1, 128>}, {transform_indices = @transform_13, window_bounds = array<i64: 1, 128, 32>}, {transform_indices = @transform_14, window_bounds = array<i64: 1, 1, 32>}, {transform_indices = @transform_15, window_bounds = array<i64: 1, 1, 32>}, {transform_indices = @transform_16, window_bounds = array<i64: 1, 1, 32>}, {transform_indices = @transform_17, window_bounds = array<i64: 1, 8, 32>}]} {
    %c0_i32 = arith.constant 0 : i32
    %0 = arith.cmpi eq, %arg1, %c0_i32 : i32
    %1 = arith.extui %0 : i1 to i32
    %c0_i32_0 = arith.constant 0 : i32
    %2 = arith.cmpi ne, %1, %c0_i32_0 : i32
    scf.if %2 {
      %c0_66 = arith.constant 0 : index
      %c0_67 = arith.constant 0 : index
      %c0_68 = arith.constant 0 : index
      %171 = vector.load %arg2[%c0_66, %c0_67, %c0_68] : memref<1x8x32xbf16, #tpu.memory_space<vmem>>, vector<1x8x32xbf16>
      %172 = vector.shape_cast %171 : vector<1x8x32xbf16> to vector<8x32xbf16>
      %173 = arith.extf %172 : vector<8x32xbf16> to vector<8x32xf32>
      %c0_69 = arith.constant 0 : index
      %c0_70 = arith.constant 0 : index
      %174 = vector.load %arg3[%c0_69, %c0_70] : memref<8x32xbf16, #tpu.memory_space<vmem>>, vector<8x32xbf16>
      %175 = arith.extf %174 : vector<8x32xbf16> to vector<8x32xf32>
      %176 = arith.addf %173, %175 : vector<8x32xf32>
      %c0_71 = arith.constant 0 : index
      %c0_72 = arith.constant 0 : index
      %177 = vector.load %arg4[%c0_71, %c0_72] : memref<1x32xbf16, #tpu.memory_space<vmem>>, vector<1x32xbf16>
      %c0_73 = arith.constant 0 : index
      %c0_74 = arith.constant 0 : index
      %178 = vector.load %arg5[%c0_73, %c0_74] : memref<1x32xbf16, #tpu.memory_space<vmem>>, vector<1x32xbf16>
      %cst_75 = arith.constant dense<0.000000e+00> : vector<8xf32>
      %179 = vector.multi_reduction <add>, %176, %cst_75 [1] : vector<8x32xf32> to vector<8xf32>
      %180 = vector.shape_cast %179 : vector<8xf32> to vector<8x1xf32>
      %cst_76 = arith.constant 3.200000e+01 : f32
      %181 = vector.broadcast %cst_76 : f32 to vector<8x1xf32>
      %182 = arith.divf %180, %181 : vector<8x1xf32>
      %183 = vector.broadcast %182 : vector<8x1xf32> to vector<8x32xf32>
      %184 = arith.subf %176, %183 : vector<8x32xf32>
      %185 = arith.mulf %184, %184 : vector<8x32xf32>
      %cst_77 = arith.constant dense<0.000000e+00> : vector<8xf32>
      %186 = vector.multi_reduction <add>, %185, %cst_77 [1] : vector<8x32xf32> to vector<8xf32>
      %187 = vector.shape_cast %186 : vector<8xf32> to vector<8x1xf32>
      %cst_78 = arith.constant 3.200000e+01 : f32
      %188 = vector.broadcast %cst_78 : f32 to vector<8x1xf32>
      %189 = arith.divf %187, %188 : vector<8x1xf32>
      %190 = vector.broadcast %182 : vector<8x1xf32> to vector<8x32xf32>
      %191 = arith.subf %176, %190 : vector<8x32xf32>
      %cst_79 = arith.constant 9.99999974E-6 : f32
      %192 = vector.broadcast %cst_79 : f32 to vector<8x1xf32>
      %193 = arith.addf %189, %192 : vector<8x1xf32>
      %194 = math.rsqrt %193 : vector<8x1xf32>
      %195 = vector.broadcast %194 : vector<8x1xf32> to vector<8x32xf32>
      %196 = arith.mulf %191, %195 : vector<8x32xf32>
      %197 = arith.extf %177 : vector<1x32xbf16> to vector<1x32xf32>
      %198 = vector.broadcast %197 : vector<1x32xf32> to vector<8x32xf32>
      %199 = arith.mulf %196, %198 : vector<8x32xf32>
      %200 = arith.extf %178 : vector<1x32xbf16> to vector<1x32xf32>
      %201 = vector.broadcast %200 : vector<1x32xf32> to vector<8x32xf32>
      %202 = arith.addf %199, %201 : vector<8x32xf32>
      %c0_80 = arith.constant 0 : index
      %c0_81 = arith.constant 0 : index
      %c0_82 = arith.constant 0 : index
      %203 = vector.load %arg20[%c0_80, %c0_81, %c0_82] : memref<1x8x32xf32, #tpu.memory_space<vmem>>, vector<1x8x32xf32>
      %204 = vector.shape_cast %203 : vector<1x8x32xf32> to vector<8x32xf32>
      %205 = vector.shape_cast %202 : vector<8x32xf32> to vector<1x8x32xf32>
      tpu.vector_store %arg20[%c0_80, %c0_81, %c0_82], %205 {strides = array<i32>} : memref<1x8x32xf32, #tpu.memory_space<vmem>>, vector<1x8x32xf32>,
    } else {
    }
    %c0 = arith.constant 0 : index
    %c0_1 = arith.constant 0 : index
    %c0_2 = arith.constant 0 : index
    %3 = vector.load %arg20[%c0, %c0_1, %c0_2] : memref<1x8x32xf32, #tpu.memory_space<vmem>>, vector<1x8x32xf32>
    %4 = vector.shape_cast %3 : vector<1x8x32xf32> to vector<8x32xf32>
    %5 = arith.truncf %4 : vector<8x32xf32> to vector<8x32xbf16>
    %c0_3 = arith.constant 0 : index
    %c0_4 = arith.constant 0 : index
    %c0_5 = arith.constant 0 : index
    %6 = vector.load %arg7[%c0_3, %c0_4, %c0_5] : memref<1x32x96xbf16, #tpu.memory_space<vmem>>, vector<1x32x96xbf16>
    %7 = vector.shape_cast %6 : vector<1x32x96xbf16> to vector<32x96xbf16>
    %cst = arith.constant dense<0.000000e+00> : vector<8x96xf32>
    %8 = tpu.matmul %5, %7, %cst {dimension_numbers = #tpu.dot_dimension_numbers<[1], [0], [0], [1], [0, 0, 1, 1], [], []>} : vector<8x32xbf16>, vector<32x96xbf16>, vector<8x96xf32> -> vector<8x96xf32>
    %c0_6 = arith.constant 0 : index
    %c0_7 = arith.constant 0 : index
    %c0_8 = arith.constant 0 : index
    %9 = vector.load %arg8[%c0_6, %c0_7, %c0_8] : memref<1x1x96xbf16, #tpu.memory_space<vmem>>, vector<1x1x96xbf16>
    %10 = vector.shape_cast %9 : vector<1x1x96xbf16> to vector<1x96xbf16>
    %11 = arith.extf %10 : vector<1x96xbf16> to vector<1x96xf32>
    %12 = vector.broadcast %11 : vector<1x96xf32> to vector<8x96xf32>
    %13 = arith.addf %8, %12 : vector<8x96xf32>
    %14 = vector.extract_strided_slice %13 {offsets = [0, 0], sizes = [8, 32], strides = [1, 1]} : vector<8x96xf32> to vector<8x32xf32>
    %15 = arith.truncf %14 : vector<8x32xf32> to vector<8x32xbf16>
    %16 = vector.extract_strided_slice %15 {offsets = [0, 0], sizes = [8, 8], strides = [1, 1]} : vector<8x32xbf16> to vector<8x8xbf16>
    %17 = vector.extract_strided_slice %15 {offsets = [0, 8], sizes = [8, 8], strides = [1, 1]} : vector<8x32xbf16> to vector<8x8xbf16>
    %18 = vector.extract_strided_slice %15 {offsets = [0, 16], sizes = [8, 8], strides = [1, 1]} : vector<8x32xbf16> to vector<8x8xbf16>
    %19 = vector.extract_strided_slice %15 {offsets = [0, 24], sizes = [8, 8], strides = [1, 1]} : vector<8x32xbf16> to vector<8x8xbf16>
    %20 = vector.shape_cast %16 : vector<8x8xbf16> to vector<1x8x8xbf16>
    %21 = vector.shape_cast %17 : vector<8x8xbf16> to vector<1x8x8xbf16>
    %22 = vector.shape_cast %18 : vector<8x8xbf16> to vector<1x8x8xbf16>
    %23 = vector.shape_cast %19 : vector<8x8xbf16> to vector<1x8x8xbf16>
    %24 = tpu.concatenate %20, %21, %22, %23 in 0 : vector<1x8x8xbf16>, vector<1x8x8xbf16>, vector<1x8x8xbf16>, vector<1x8x8xbf16> -> vector<4x8x8xbf16>
    %25 = vector.extract_strided_slice %13 {offsets = [0, 32], sizes = [8, 32], strides = [1, 1]} : vector<8x96xf32> to vector<8x32xf32>
    %26 = arith.truncf %25 : vector<8x32xf32> to vector<8x32xbf16>
    %27 = vector.extract_strided_slice %26 {offsets = [0, 0], sizes = [8, 8], strides = [1, 1]} : vector<8x32xbf16> to vector<8x8xbf16>
    %28 = vector.extract_strided_slice %26 {offsets = [0, 8], sizes = [8, 8], strides = [1, 1]} : vector<8x32xbf16> to vector<8x8xbf16>
    %29 = vector.extract_strided_slice %26 {offsets = [0, 16], sizes = [8, 8], strides = [1, 1]} : vector<8x32xbf16> to vector<8x8xbf16>
    %30 = vector.extract_strided_slice %26 {offsets = [0, 24], sizes = [8, 8], strides = [1, 1]} : vector<8x32xbf16> to vector<8x8xbf16>
    %31 = vector.shape_cast %27 : vector<8x8xbf16> to vector<1x8x8xbf16>
    %32 = vector.shape_cast %28 : vector<8x8xbf16> to vector<1x8x8xbf16>
    %33 = vector.shape_cast %29 : vector<8x8xbf16> to vector<1x8x8xbf16>
    %34 = vector.shape_cast %30 : vector<8x8xbf16> to vector<1x8x8xbf16>
    %35 = tpu.concatenate %31, %32, %33, %34 in 0 : vector<1x8x8xbf16>, vector<1x8x8xbf16>, vector<1x8x8xbf16>, vector<1x8x8xbf16> -> vector<4x8x8xbf16>
    %36 = vector.extract_strided_slice %13 {offsets = [0, 64], sizes = [8, 32], strides = [1, 1]} : vector<8x96xf32> to vector<8x32xf32>
    %37 = arith.truncf %36 : vector<8x32xf32> to vector<8x32xbf16>
    %38 = vector.extract_strided_slice %37 {offsets = [0, 0], sizes = [8, 8], strides = [1, 1]} : vector<8x32xbf16> to vector<8x8xbf16>
    %39 = vector.extract_strided_slice %37 {offsets = [0, 8], sizes = [8, 8], strides = [1, 1]} : vector<8x32xbf16> to vector<8x8xbf16>
    %40 = vector.extract_strided_slice %37 {offsets = [0, 16], sizes = [8, 8], strides = [1, 1]} : vector<8x32xbf16> to vector<8x8xbf16>
    %41 = vector.extract_strided_slice %37 {offsets = [0, 24], sizes = [8, 8], strides = [1, 1]} : vector<8x32xbf16> to vector<8x8xbf16>
    %42 = vector.shape_cast %38 : vector<8x8xbf16> to vector<1x8x8xbf16>
    %43 = vector.shape_cast %39 : vector<8x8xbf16> to vector<1x8x8xbf16>
    %44 = vector.shape_cast %40 : vector<8x8xbf16> to vector<1x8x8xbf16>
    %45 = vector.shape_cast %41 : vector<8x8xbf16> to vector<1x8x8xbf16>
    %46 = tpu.concatenate %42, %43, %44, %45 in 0 : vector<1x8x8xbf16>, vector<1x8x8xbf16>, vector<1x8x8xbf16>, vector<1x8x8xbf16> -> vector<4x8x8xbf16>
    %c0_9 = arith.constant 0 : index
    %c0_10 = arith.constant 0 : index
    %c0_11 = arith.constant 0 : index
    %47 = vector.load %arg6[%c0_9, %c0_10, %c0_11] : memref<1x1x8xf32, #tpu.memory_space<vmem>>, vector<1x1x8xf32>
    %48 = vector.shape_cast %47 : vector<1x1x8xf32> to vector<1x8xf32>
    %cst_12 = arith.constant 1.000000e+00 : f32
    %49 = vector.broadcast %cst_12 : f32 to vector<1x8xf32>
    %50 = arith.subf %49, %48 : vector<1x8xf32>
    %cst_13 = arith.constant -1.000000e+09 : f32
    %51 = vector.broadcast %cst_13 : f32 to vector<1x8xf32>
    %52 = arith.mulf %50, %51 : vector<1x8xf32>
    "tpu.trace_start"() <{level = 10 : i32, message = "nid,njd->nij"}> : () -> ()
    %cst_14 = arith.constant dense<0.000000e+00> : vector<4x8x8xf32>
    %53 = tpu.matmul %24, %35, %cst_14 {dimension_numbers = #tpu.dot_dimension_numbers<[2], [2], [1], [1], [0, 0, 0, 1, 1, 1], [0], [0]>} : vector<4x8x8xbf16>, vector<4x8x8xbf16>, vector<4x8x8xf32> -> vector<4x8x8xf32>
    "tpu.trace_stop"() : () -> ()
    %54 = vector.shape_cast %52 : vector<1x8xf32> to vector<1x1x8xf32>
    %55 = vector.broadcast %54 : vector<1x1x8xf32> to vector<4x8x8xf32>
    %56 = arith.addf %53, %55 : vector<4x8x8xf32>
    %cst_15 = arith.constant dense<0xFF800000> : vector<4x8xf32>
    %57 = vector.multi_reduction <maximumf>, %56, %cst_15 [2] : vector<4x8x8xf32> to vector<4x8xf32>
    %58 = vector.shape_cast %57 : vector<4x8xf32> to vector<4x8x1xf32>
    %59 = vector.broadcast %58 : vector<4x8x1xf32> to vector<4x8x8xf32>
    %60 = arith.subf %56, %59 : vector<4x8x8xf32>
    %61 = math.exp %60 : vector<4x8x8xf32>
    %cst_16 = arith.constant dense<0.000000e+00> : vector<4x8xf32>
    %62 = vector.multi_reduction <add>, %61, %cst_16 [2] : vector<4x8x8xf32> to vector<4x8xf32>
    %63 = vector.shape_cast %62 : vector<4x8xf32> to vector<4x8x1xf32>
    %64 = tpu.reciprocal %63 {approx = true} : vector<4x8x1xf32> -> vector<4x8x1xf32>
    %65 = vector.broadcast %64 : vector<4x8x1xf32> to vector<4x8x8xf32>
    %66 = arith.mulf %61, %65 : vector<4x8x8xf32>
    %67 = arith.truncf %66 : vector<4x8x8xf32> to vector<4x8x8xbf16>
    "tpu.trace_start"() <{level = 10 : i32, message = "nij,njd->nid"}> : () -> ()
    %cst_17 = arith.constant dense<0.000000e+00> : vector<4x8x8xf32>
    %68 = tpu.matmul %67, %46, %cst_17 {dimension_numbers = #tpu.dot_dimension_numbers<[2], [1], [1], [2], [0, 0, 0, 1, 1, 2], [0], [0]>} : vector<4x8x8xbf16>, vector<4x8x8xbf16>, vector<4x8x8xf32> -> vector<4x8x8xf32>
    "tpu.trace_stop"() : () -> ()
    %69 = vector.extract_strided_slice %68 {offsets = [0, 0, 0], sizes = [1, 8, 8], strides = [1, 1, 1]} : vector<4x8x8xf32> to vector<1x8x8xf32>
    %70 = vector.shape_cast %69 : vector<1x8x8xf32> to vector<8x8xf32>
    %71 = vector.extract_strided_slice %68 {offsets = [1, 0, 0], sizes = [1, 8, 8], strides = [1, 1, 1]} : vector<4x8x8xf32> to vector<1x8x8xf32>
    %72 = vector.shape_cast %71 : vector<1x8x8xf32> to vector<8x8xf32>
    %73 = vector.extract_strided_slice %68 {offsets = [2, 0, 0], sizes = [1, 8, 8], strides = [1, 1, 1]} : vector<4x8x8xf32> to vector<1x8x8xf32>
    %74 = vector.shape_cast %73 : vector<1x8x8xf32> to vector<8x8xf32>
    %75 = vector.extract_strided_slice %68 {offsets = [3, 0, 0], sizes = [1, 8, 8], strides = [1, 1, 1]} : vector<4x8x8xf32> to vector<1x8x8xf32>
    %76 = vector.shape_cast %75 : vector<1x8x8xf32> to vector<8x8xf32>
    %77 = tpu.concatenate %70, %72, %74, %76 in 1 : vector<8x8xf32>, vector<8x8xf32>, vector<8x8xf32>, vector<8x8xf32> -> vector<8x32xf32>
    %78 = arith.truncf %77 : vector<8x32xf32> to vector<8x32xbf16>
    %c0_18 = arith.constant 0 : index
    %c0_19 = arith.constant 0 : index
    %c0_20 = arith.constant 0 : index
    %79 = vector.load %arg9[%c0_18, %c0_19, %c0_20] : memref<1x32x32xbf16, #tpu.memory_space<vmem>>, vector<1x32x32xbf16>
    %80 = vector.shape_cast %79 : vector<1x32x32xbf16> to vector<32x32xbf16>
    %cst_21 = arith.constant dense<0.000000e+00> : vector<8x32xf32>
    %81 = tpu.matmul %78, %80, %cst_21 {dimension_numbers = #tpu.dot_dimension_numbers<[1], [0], [0], [1], [0, 0, 1, 1], [], []>} : vector<8x32xbf16>, vector<32x32xbf16>, vector<8x32xf32> -> vector<8x32xf32>
    %c0_22 = arith.constant 0 : index
    %c0_23 = arith.constant 0 : index
    %c0_24 = arith.constant 0 : index
    %82 = vector.load %arg10[%c0_22, %c0_23, %c0_24] : memref<1x1x32xbf16, #tpu.memory_space<vmem>>, vector<1x1x32xbf16>
    %83 = vector.shape_cast %82 : vector<1x1x32xbf16> to vector<1x32xbf16>
    %84 = arith.extf %83 : vector<1x32xbf16> to vector<1x32xf32>
    %85 = vector.broadcast %84 : vector<1x32xf32> to vector<8x32xf32>
    %86 = arith.addf %81, %85 : vector<8x32xf32>
    %87 = arith.addf %4, %86 : vector<8x32xf32>
    %c0_25 = arith.constant 0 : index
    %c0_26 = arith.constant 0 : index
    %c0_27 = arith.constant 0 : index
    %88 = vector.load %arg11[%c0_25, %c0_26, %c0_27] : memref<1x1x32xbf16, #tpu.memory_space<vmem>>, vector<1x1x32xbf16>
    %89 = vector.shape_cast %88 : vector<1x1x32xbf16> to vector<1x32xbf16>
    %c0_28 = arith.constant 0 : index
    %c0_29 = arith.constant 0 : index
    %c0_30 = arith.constant 0 : index
    %90 = vector.load %arg12[%c0_28, %c0_29, %c0_30] : memref<1x1x32xbf16, #tpu.memory_space<vmem>>, vector<1x1x32xbf16>
    %91 = vector.shape_cast %90 : vector<1x1x32xbf16> to vector<1x32xbf16>
    %cst_31 = arith.constant dense<0.000000e+00> : vector<8xf32>
    %92 = vector.multi_reduction <add>, %87, %cst_31 [1] : vector<8x32xf32> to vector<8xf32>
    %93 = vector.shape_cast %92 : vector<8xf32> to vector<8x1xf32>
    %cst_32 = arith.constant 3.200000e+01 : f32
    %94 = vector.broadcast %cst_32 : f32 to vector<8x1xf32>
    %95 = arith.divf %93, %94 : vector<8x1xf32>
    %96 = vector.broadcast %95 : vector<8x1xf32> to vector<8x32xf32>
    %97 = arith.subf %87, %96 : vector<8x32xf32>
    %98 = arith.mulf %97, %97 : vector<8x32xf32>
    %cst_33 = arith.constant dense<0.000000e+00> : vector<8xf32>
    %99 = vector.multi_reduction <add>, %98, %cst_33 [1] : vector<8x32xf32> to vector<8xf32>
    %100 = vector.shape_cast %99 : vector<8xf32> to vector<8x1xf32>
    %cst_34 = arith.constant 3.200000e+01 : f32
    %101 = vector.broadcast %cst_34 : f32 to vector<8x1xf32>
    %102 = arith.divf %100, %101 : vector<8x1xf32>
    %103 = vector.broadcast %95 : vector<8x1xf32> to vector<8x32xf32>
    %104 = arith.subf %87, %103 : vector<8x32xf32>
    %cst_35 = arith.constant 9.99999974E-6 : f32
    %105 = vector.broadcast %cst_35 : f32 to vector<8x1xf32>
    %106 = arith.addf %102, %105 : vector<8x1xf32>
    %107 = math.rsqrt %106 : vector<8x1xf32>
    %108 = vector.broadcast %107 : vector<8x1xf32> to vector<8x32xf32>
    %109 = arith.mulf %104, %108 : vector<8x32xf32>
    %110 = arith.extf %89 : vector<1x32xbf16> to vector<1x32xf32>
    %111 = vector.broadcast %110 : vector<1x32xf32> to vector<8x32xf32>
    %112 = arith.mulf %109, %111 : vector<8x32xf32>
    %113 = arith.extf %91 : vector<1x32xbf16> to vector<1x32xf32>
    %114 = vector.broadcast %113 : vector<1x32xf32> to vector<8x32xf32>
    %115 = arith.addf %112, %114 : vector<8x32xf32>
    %116 = arith.truncf %115 : vector<8x32xf32> to vector<8x32xbf16>
    %c0_36 = arith.constant 0 : index
    %c0_37 = arith.constant 0 : index
    %c0_38 = arith.constant 0 : index
    %117 = vector.load %arg13[%c0_36, %c0_37, %c0_38] : memref<1x32x128xbf16, #tpu.memory_space<vmem>>, vector<1x32x128xbf16>
    %118 = vector.shape_cast %117 : vector<1x32x128xbf16> to vector<32x128xbf16>
    %cst_39 = arith.constant dense<0.000000e+00> : vector<8x128xf32>
    %119 = tpu.matmul %116, %118, %cst_39 {dimension_numbers = #tpu.dot_dimension_numbers<[1], [0], [0], [1], [0, 0, 1, 1], [], []>} : vector<8x32xbf16>, vector<32x128xbf16>, vector<8x128xf32> -> vector<8x128xf32>
    %c0_40 = arith.constant 0 : index
    %c0_41 = arith.constant 0 : index
    %c0_42 = arith.constant 0 : index
    %120 = vector.load %arg14[%c0_40, %c0_41, %c0_42] : memref<1x1x128xbf16, #tpu.memory_space<vmem>>, vector<1x1x128xbf16>
    %121 = vector.shape_cast %120 : vector<1x1x128xbf16> to vector<1x128xbf16>
    %122 = arith.extf %121 : vector<1x128xbf16> to vector<1x128xf32>
    %123 = vector.broadcast %122 : vector<1x128xf32> to vector<8x128xf32>
    %124 = arith.addf %119, %123 : vector<8x128xf32>
    %cst_43 = arith.constant 0.000000e+00 : f32
    %125 = vector.broadcast %cst_43 : f32 to vector<8x128xf32>
    %126 = arith.maximumf %124, %125 : vector<8x128xf32>
    %127 = arith.truncf %126 : vector<8x128xf32> to vector<8x128xbf16>
    %c0_44 = arith.constant 0 : index
    %c0_45 = arith.constant 0 : index
    %c0_46 = arith.constant 0 : index
    %128 = vector.load %arg15[%c0_44, %c0_45, %c0_46] : memref<1x128x32xbf16, #tpu.memory_space<vmem>>, vector<1x128x32xbf16>
    %129 = vector.shape_cast %128 : vector<1x128x32xbf16> to vector<128x32xbf16>
    %cst_47 = arith.constant dense<0.000000e+00> : vector<8x32xf32>
    %130 = tpu.matmul %127, %129, %cst_47 {dimension_numbers = #tpu.dot_dimension_numbers<[1], [0], [0], [1], [0, 0, 1, 1], [], []>} : vector<8x128xbf16>, vector<128x32xbf16>, vector<8x32xf32> -> vector<8x32xf32>
    %c0_48 = arith.constant 0 : index
    %c0_49 = arith.constant 0 : index
    %c0_50 = arith.constant 0 : index
    %131 = vector.load %arg16[%c0_48, %c0_49, %c0_50] : memref<1x1x32xbf16, #tpu.memory_space<vmem>>, vector<1x1x32xbf16>
    %132 = vector.shape_cast %131 : vector<1x1x32xbf16> to vector<1x32xbf16>
    %133 = arith.extf %132 : vector<1x32xbf16> to vector<1x32xf32>
    %134 = vector.broadcast %133 : vector<1x32xf32> to vector<8x32xf32>
    %135 = arith.addf %130, %134 : vector<8x32xf32>
    %136 = arith.addf %115, %135 : vector<8x32xf32>
    %c0_51 = arith.constant 0 : index
    %c0_52 = arith.constant 0 : index
    %c0_53 = arith.constant 0 : index
    %137 = vector.load %arg17[%c0_51, %c0_52, %c0_53] : memref<1x1x32xbf16, #tpu.memory_space<vmem>>, vector<1x1x32xbf16>
    %138 = vector.shape_cast %137 : vector<1x1x32xbf16> to vector<1x32xbf16>
    %c0_54 = arith.constant 0 : index
    %c0_55 = arith.constant 0 : index
    %c0_56 = arith.constant 0 : index
    %139 = vector.load %arg18[%c0_54, %c0_55, %c0_56] : memref<1x1x32xbf16, #tpu.memory_space<vmem>>, vector<1x1x32xbf16>
    %140 = vector.shape_cast %139 : vector<1x1x32xbf16> to vector<1x32xbf16>
    %cst_57 = arith.constant dense<0.000000e+00> : vector<8xf32>
    %141 = vector.multi_reduction <add>, %136, %cst_57 [1] : vector<8x32xf32> to vector<8xf32>
    %142 = vector.shape_cast %141 : vector<8xf32> to vector<8x1xf32>
    %cst_58 = arith.constant 3.200000e+01 : f32
    %143 = vector.broadcast %cst_58 : f32 to vector<8x1xf32>
    %144 = arith.divf %142, %143 : vector<8x1xf32>
    %145 = vector.broadcast %144 : vector<8x1xf32> to vector<8x32xf32>
    %146 = arith.subf %136, %145 : vector<8x32xf32>
    %147 = arith.mulf %146, %146 : vector<8x32xf32>
    %cst_59 = arith.constant dense<0.000000e+00> : vector<8xf32>
    %148 = vector.multi_reduction <add>, %147, %cst_59 [1] : vector<8x32xf32> to vector<8xf32>
    %149 = vector.shape_cast %148 : vector<8xf32> to vector<8x1xf32>
    %cst_60 = arith.constant 3.200000e+01 : f32
    %150 = vector.broadcast %cst_60 : f32 to vector<8x1xf32>
    %151 = arith.divf %149, %150 : vector<8x1xf32>
    %152 = vector.broadcast %144 : vector<8x1xf32> to vector<8x32xf32>
    %153 = arith.subf %136, %152 : vector<8x32xf32>
    %cst_61 = arith.constant 9.99999974E-6 : f32
    %154 = vector.broadcast %cst_61 : f32 to vector<8x1xf32>
    %155 = arith.addf %151, %154 : vector<8x1xf32>
    %156 = math.rsqrt %155 : vector<8x1xf32>
    %157 = vector.broadcast %156 : vector<8x1xf32> to vector<8x32xf32>
    %158 = arith.mulf %153, %157 : vector<8x32xf32>
    %159 = arith.extf %138 : vector<1x32xbf16> to vector<1x32xf32>
    %160 = vector.broadcast %159 : vector<1x32xf32> to vector<8x32xf32>
    %161 = arith.mulf %158, %160 : vector<8x32xf32>
    %162 = arith.extf %140 : vector<1x32xbf16> to vector<1x32xf32>
    %163 = vector.broadcast %162 : vector<1x32xf32> to vector<8x32xf32>
    %164 = arith.addf %161, %163 : vector<8x32xf32>
    %c0_62 = arith.constant 0 : index
    %c0_63 = arith.constant 0 : index
    %c0_64 = arith.constant 0 : index
    %165 = vector.load %arg20[%c0_62, %c0_63, %c0_64] : memref<1x8x32xf32, #tpu.memory_space<vmem>>, vector<1x8x32xf32>
    %166 = vector.shape_cast %165 : vector<1x8x32xf32> to vector<8x32xf32>
    %167 = vector.shape_cast %164 : vector<8x32xf32> to vector<1x8x32xf32>
    tpu.vector_store %arg20[%c0_62, %c0_63, %c0_64], %167 {strides = array<i32>} : memref<1x8x32xf32, #tpu.memory_space<vmem>>, vector<1x8x32xf32>,
    %c1_i32 = arith.constant 1 : i32
    %168 = arith.cmpi eq, %arg1, %c1_i32 : i32
    %169 = arith.extui %168 : i1 to i32
    %c0_i32_65 = arith.constant 0 : i32
    %170 = arith.cmpi ne, %169, %c0_i32_65 : i32
    scf.if %170 {
      %c0_66 = arith.constant 0 : index
      %c0_67 = arith.constant 0 : index
      %c0_68 = arith.constant 0 : index
      %171 = vector.load %arg20[%c0_66, %c0_67, %c0_68] : memref<1x8x32xf32, #tpu.memory_space<vmem>>, vector<1x8x32xf32>
      %172 = vector.shape_cast %171 : vector<1x8x32xf32> to vector<8x32xf32>
      %173 = arith.truncf %172 : vector<8x32xf32> to vector<8x32xbf16>
      %c0_69 = arith.constant 0 : index
      %c0_70 = arith.constant 0 : index
      %c0_71 = arith.constant 0 : index
      %174 = vector.load %arg19[%c0_69, %c0_70, %c0_71] : memref<1x8x32xbf16, #tpu.memory_space<vmem>>, vector<1x8x32xbf16>
      %175 = vector.shape_cast %174 : vector<1x8x32xbf16> to vector<8x32xbf16>
      %176 = vector.shape_cast %173 : vector<8x32xbf16> to vector<1x8x32xbf16>
      tpu.vector_store %arg19[%c0_69, %c0_70, %c0_71], %176 {strides = array<i32>} : memref<1x8x32xbf16, #tpu.memory_space<vmem>>, vector<1x8x32xbf16>,
    } else {
    }
    return
  }
  func.func @transform_0(%arg0: i32, %arg1: i32) -> (i32, i32, i32) {
    %c0_i32 = arith.constant 0 : i32
    %c0_i32_0 = arith.constant 0 : i32
    %c0_i32_1 = arith.constant 0 : i32
    return %arg0, %c0_i32, %c0_i32_0 : i32, i32, i32
  }
  func.func @transform_1(%arg0: i32, %arg1: i32) -> (i32, i32) {
    %c0_i32 = arith.constant 0 : i32
    %c0_i32_0 = arith.constant 0 : i32
    %c0_i32_1 = arith.constant 0 : i32
    return %c0_i32, %c0_i32_0 : i32, i32
  }
  func.func @transform_2(%arg0: i32, %arg1: i32) -> (i32, i32) {
    %c0_i32 = arith.constant 0 : i32
    %c0_i32_0 = arith.constant 0 : i32
    %c0_i32_1 = arith.constant 0 : i32
    return %c0_i32, %c0_i32_0 : i32, i32
  }
  func.func @transform_3(%arg0: i32, %arg1: i32) -> (i32, i32) {
    %c0_i32 = arith.constant 0 : i32
    %c0_i32_0 = arith.constant 0 : i32
    %c0_i32_1 = arith.constant 0 : i32
    return %c0_i32, %c0_i32_0 : i32, i32
  }
  func.func @transform_4(%arg0: i32, %arg1: i32) -> (i32, i32, i32) {
    %c0_i32 = arith.constant 0 : i32
    %c0_i32_0 = arith.constant 0 : i32
    %c0_i32_1 = arith.constant 0 : i32
    return %arg0, %c0_i32, %c0_i32_0 : i32, i32, i32
  }
  func.func @transform_5(%arg0: i32, %arg1: i32) -> (i32, i32, i32) {
    %c0_i32 = arith.constant 0 : i32
    %c0_i32_0 = arith.constant 0 : i32
    %c0_i32_1 = arith.constant 0 : i32
    return %arg1, %c0_i32, %c0_i32_0 : i32, i32, i32
  }
  func.func @transform_6(%arg0: i32, %arg1: i32) -> (i32, i32, i32) {
    %c0_i32 = arith.constant 0 : i32
    %c0_i32_0 = arith.constant 0 : i32
    %c0_i32_1 = arith.constant 0 : i32
    return %arg1, %c0_i32, %c0_i32_0 : i32, i32, i32
  }
  func.func @transform_7(%arg0: i32, %arg1: i32) -> (i32, i32, i32) {
    %c0_i32 = arith.constant 0 : i32
    %c0_i32_0 = arith.constant 0 : i32
    %c0_i32_1 = arith.constant 0 : i32
    return %arg1, %c0_i32, %c0_i32_0 : i32, i32, i32
  }
  func.func @transform_8(%arg0: i32, %arg1: i32) -> (i32, i32, i32) {
    %c0_i32 = arith.constant 0 : i32
    %c0_i32_0 = arith.constant 0 : i32
    %c0_i32_1 = arith.constant 0 : i32
    return %arg1, %c0_i32, %c0_i32_0 : i32, i32, i32
  }
  func.func @transform_9(%arg0: i32, %arg1: i32) -> (i32, i32, i32) {
    %c0_i32 = arith.constant 0 : i32
    %c0_i32_0 = arith.constant 0 : i32
    %c0_i32_1 = arith.constant 0 : i32
    return %arg1, %c0_i32, %c0_i32_0 : i32, i32, i32
  }
  func.func @transform_10(%arg0: i32, %arg1: i32) -> (i32, i32, i32) {
    %c0_i32 = arith.constant 0 : i32
    %c0_i32_0 = arith.constant 0 : i32
    %c0_i32_1 = arith.constant 0 : i32
    return %arg1, %c0_i32, %c0_i32_0 : i32, i32, i32
  }
  func.func @transform_11(%arg0: i32, %arg1: i32) -> (i32, i32, i32) {
    %c0_i32 = arith.constant 0 : i32
    %c0_i32_0 = arith.constant 0 : i32
    %c0_i32_1 = arith.constant 0 : i32
    return %arg1, %c0_i32, %c0_i32_0 : i32, i32, i32
  }
  func.func @transform_12(%arg0: i32, %arg1: i32) -> (i32, i32, i32) {
    %c0_i32 = arith.constant 0 : i32
    %c0_i32_0 = arith.constant 0 : i32
    %c0_i32_1 = arith.constant 0 : i32
    return %arg1, %c0_i32, %c0_i32_0 : i32, i32, i32
  }
  func.func @transform_13(%arg0: i32, %arg1: i32) -> (i32, i32, i32) {
    %c0_i32 = arith.constant 0 : i32
    %c0_i32_0 = arith.constant 0 : i32
    %c0_i32_1 = arith.constant 0 : i32
    return %arg1, %c0_i32, %c0_i32_0 : i32, i32, i32
  }
  func.func @transform_14(%arg0: i32, %arg1: i32) -> (i32, i32, i32) {
    %c0_i32 = arith.constant 0 : i32
    %c0_i32_0 = arith.constant 0 : i32
    %c0_i32_1 = arith.constant 0 : i32
    return %arg1, %c0_i32, %c0_i32_0 : i32, i32, i32
  }
  func.func @transform_15(%arg0: i32, %arg1: i32) -> (i32, i32, i32) {
    %c0_i32 = arith.constant 0 : i32
    %c0_i32_0 = arith.constant 0 : i32
    %c0_i32_1 = arith.constant 0 : i32
    return %arg1, %c0_i32, %c0_i32_0 : i32, i32, i32
  }
  func.func @transform_16(%arg0: i32, %arg1: i32) -> (i32, i32, i32) {
    %c0_i32 = arith.constant 0 : i32
    %c0_i32_0 = arith.constant 0 : i32
    %c0_i32_1 = arith.constant 0 : i32
    return %arg1, %c0_i32, %c0_i32_0 : i32, i32, i32
  }
  func.func @transform_17(%arg0: i32, %arg1: i32) -> (i32, i32, i32) {
    %c0_i32 = arith.constant 0 : i32
    %c0_i32_0 = arith.constant 0 : i32
    %c0_i32_1 = arith.constant 0 : i32
    return %arg0, %c0_i32, %c0_i32_0 : i32, i32, i32
  }
}

</mosaic_0001>

<bundles_post_ra>
// kernel: tpu_custom_call.1
= control target key start
LH: loop header
LB: loop body
LE: loop exit
PB: predicated region body
PF: predicated region fallthrough
CT: control target
= control target key end

     0   :  { %s2284_s0 = inlined_call_operand.vmem [shape: bf16[2,8,32], index: 0, kind: input, shape index: {}]   ;;  %s2285_s1 = inlined_call_operand.vmem [shape: bf16[8,32], index: 1, kind: input, shape index: {}]   ;;  %s2286_s2 = inlined_call_operand.vmem [shape: bf16[1,32], index: 2, kind: input, shape index: {}]   ;;  %s2287_s3 = inlined_call_operand.vmem [shape: bf16[1,32], index: 3, kind: input, shape index: {}]   ;;  %s2288_s4 = inlined_call_operand.vmem [shape: f32[2,1,8], index: 4, kind: input, shape index: {}]   ;;  %s2289_s5 = inlined_call_operand.vmem [shape: bf16[2,32,96], index: 5, kind: input, shape index: {}]   ;;  %s2290_s6 = inlined_call_operand.vmem [shape: bf16[2,1,96], index: 6, kind: input, shape index: {}]   ;;  %s2291_s7 = inlined_call_operand.vmem [shape: bf16[2,32,32], index: 7, kind: input, shape index: {}]   ;;  %s2292_s8 = inlined_call_operand.vmem [shape: bf16[2,1,32], index: 8, kind: input, shape index: {}]   ;;  %s2293_s9 = inlined_call_operand.vmem [shape: bf16[2,1,32], index: 9, kind: input, shape index: {}]   ;;  %s2294_s10 = inlined_call_operand.vmem [shape: bf16[2,1,32], index: 10, kind: input, shape index: {}]   ;;  %s2295_s11 = inlined_call_operand.vmem [shape: bf16[2,32,128], index: 11, kind: input, shape index: {}]   ;;  %s2296_s12 = inlined_call_operand.vmem [shape: bf16[2,1,128], index: 12, kind: input, shape index: {}]   ;;  %s2297_s13 = inlined_call_operand.vmem [shape: bf16[2,128,32], index: 13, kind: input, shape index: {}]   ;;  %s2298_s14 = inlined_call_operand.vmem [shape: bf16[2,1,32], index: 14, kind: input, shape index: {}]   ;;  %s2299_s15 = inlined_call_operand.vmem [shape: bf16[2,1,32], index: 15, kind: input, shape index: {}]   ;;  %s2300_s16 = inlined_call_operand.vmem [shape: bf16[2,1,32], index: 16, kind: input, shape index: {}]   ;;  %s2301_s17 = inlined_call_operand.hbm [shape: bf16[2,8,32], index: 17, kind: output, shape index: {}]  }
   0x1   :  { %2317 = sst [smem:[#allocation19_spill]] %s2284_s0 }
   0x2   :  { %2318 = sst [smem:[#allocation20_spill]] %s2285_s1 }
   0x3   :  { %2319 = sst [smem:[#allocation21_spill]] %s2286_s2 }
   0x4   :  { %2320 = sst [smem:[#allocation22_spill]] %s2287_s3 }
   0x5   :  { %2321 = sst [smem:[#allocation23_spill]] %s2288_s4 }
   0x6   :  { %2322 = sst [smem:[#allocation24_spill]] %s2289_s5 }
   0x7   :  { %2323 = sst [smem:[#allocation25_spill]] %s2291_s7 }
   0x8   :  { %2324 = sst [smem:[#allocation26_spill]] %s2294_s10 }
   0x9   :  { %2325 = sst [smem:[#allocation27_spill]] %s2295_s11 }
   0xa   :  { %2326 = sst [smem:[#allocation28_spill]] %s2299_s15 }
   0xb   :  { %2327 = sst [smem:[#allocation29_spill]] %s2300_s16 }
   0xc   :  { %2328 = sst [smem:[#allocation30_spill]] %s2301_s17 }
   0xd   :  { %22 = vsyncpa [#allocation4], 0 }
   0xe   :  { %24 = vsyncpa [#allocation4 + $0x1], 0  ;;  %s1962_s24 = smov 0   ;;  %s1964_s25 = smov 0  }
   0xf   :  { %s1966_s26 = smov 0   ;;  %s1968_s27 = smov 0  }
  0x10   :  { %s1970_s28 = smov 0   ;;  %s1972_s29 = smov 0  }
  0x11   :  { %s1974_s0 = smov 0   ;;  %s1976_s30 = smov 0  }
  0x12 LB: > { %2329 = sst [smem:[#allocation6_spill]] %s1832_s24  ;;  %s1553_s18 = sadd.s32 4294967295, %s1860_s30   ;;  %s1860_s30 = sphi %s1976_s30, %s30_s30   ;;  %s1856_s0 = sphi %s1974_s0, %s2381_s0   ;;  %s1852_s29 = sphi %s1972_s29, %s2380_s29   ;;  %s1848_s28 = sphi %s1970_s28, %s2379_s28   ;;  %s1844_s27 = sphi %s1968_s27, %s2378_s27   ;;  %s1840_s26 = sphi %s1966_s26, %s2377_s26   ;;  %s1836_s25 = sphi %s1964_s25, %s2376_s25   ;;  %s1832_s24 = sphi %s1962_s24, %s2375_s24  }
  0x13   : > { %2330 = sst [smem:[#allocation7_spill]] %s1836_s25  ;;  %s1554_s19 = sadd.s32 4294967294, %s1860_s30  }
  0x14   : > { %2331 = sst [smem:[#allocation8_spill]] %s1840_s26  ;;  %s39_s1 = sadd.s32 1, %s1852_s29 }
  0x15   : > { %2332 = sst [smem:[#allocation9_spill]] %s1844_s27  ;;  %p40_p0 = scmp.ge.s32.totalorder %s39_s1, 2 }
  0x16   : > { %2333 = sst [smem:[#allocation10_spill]] %s1848_s28  ;;  %s42_s20 = sadd.s32 1, %s1856_s0 }
  0x17   : > { %2334 = sst [smem:[#allocation11_spill]] %s1852_s29  ;;  %p486_p1 = scmp.ne.s32.totalorder %s1840_s26, %s1836_s25 }
  0x18   : > { %2335 = sst [smem:[#allocation12_spill]] %s1856_s0  ;;  %p487_p2 = scmp.eq.s32.totalorder %s1553_s18, 3 }
  0x19   : > { %2336 = sst [smem:[#allocation13_spill]] %s1860_s30  ;;  %s2383_s1 = smov (%p40_p0, %s39_s1), 0 }
  0x1a   : > { %2337 = sst [smem:[#allocation14_spill]] %s2383_s1  ;;  %s2385_s20 = smov (!%p40_p0, %s42_s20), %s1856_s0 }
  0x1b   : > { %p2011_p3 = por %p487_p2, %p486_p1  ;;  %p492_p4 = scmp.ne.s32.totalorder %s1836_s25, %s1832_s24 }
  0x1c   : > { %p44_p5 = scmp.ge.s32.totalorder %s2385_s20, 2  ;;  %p493_p6 = scmp.eq.s32.totalorder %s1554_s19, 3 }
  0x1d   : > { %s2338_s21 = scalar_select %p2011_p3, 1, 0 }
  0x1e   : > { %p1557_p7 = scmp.ge.s32.totalorder %s1860_s30, 1  ;;  %p613_p8 = scmp.lt.s32.totalorder %s1860_s30, 5 }
  0x1f   : > { %2339 = sst [smem:[#allocation15_spill]] %s2338_s21  ;;  %s2387_s20 = smov (%p44_p5, %s2385_s20), 0 }
  0x20   : > { %2340 = sst [smem:[#allocation16_spill]] %s2387_s20  ;;  %p2021_p9 = por %p493_p6, %p492_p4 }
  0x21   : > { %p614_p10 = pnand %p1557_p7, %p613_p8  ;;  %s473_s23 = ssub.s32 %s1856_s0, %s2387_s20 }
  0x22   : > { %s2341_s22 = scalar_select %p2021_p9, 1, 0 }
  0x23   : > { %s476_s18 = sadd.s32 1, %s1840_s26  ;;  %p474_p11 = scmp.eq.s32.totalorder %s473_s23, 0 }
  0x24   : > { %2342 = sst [smem:[#allocation17_spill]] %s2341_s22  ;;  %617 = sbr.rel (%p614_p10) target bundleno = 2332 (0x91c), region = 88 }
  0x25   : > { %s2029_s1 = scalar_select %p474_p11, %s1840_s26, %s476_s18  }
  0x26   : > { %s2305_s19 = sand.u32 (!%p614_p10), 1, %s1836_s25   ;;  %p711_p12 = scmp.lt.s32.totalorder (!%p614_p10), %s1848_s28, 1 }
  0x27   : > { %2343 = sst [smem:[#allocation18_spill]] %s2029_s1  ;;  %s2035_s29 = sshll.u32 (!%p614_p10), %s2305_s19, 2 }
  0x28   : > { %p718_p13 = scmp.lt.s32.totalorder (!%p614_p10), %s1844_s27, 1  ;;  %s2345_s24 = sld [smem:[#allocation19_spill]] (!%p614_p10) }
  0x29   : > { %s2039_s22 = scalar_select %p711_p12, %s1848_s28, 1 }
  0x2a   : > { %s2042_s23 = scalar_select %p718_p13, %s1844_s27, 1 }
  0x2b   : > { %s1559_s18 = sshll.u32 %s2039_s22, 2  ;;  %s2346_s5 = sld [smem:[#allocation24_spill]] }
  0x2c   : > { %s1641_s17 = sshll.u32 %s2042_s23, 4  ;;  %s2347_s7 = sld [smem:[#allocation25_spill]] }
  0x2d   : > { %s2349_s11 = sld [smem:[#allocation27_spill]]  ;;  %s747_s27 = scalar_lea.vmem %s2296_s12, %s2042_s23 }
  0x2e   : > { %s714_s30 = scalar_lea.vmem %s2345_s24, %s1559_s18  ;;  %s710_s15 = scalar_lea.vmem [#allocation3], %s2035_s29 }
  0x2f   : > { %s2352_s16 = sld [smem:[#allocation9_spill]] }
  0x31   : > { %s2056_s28 = scalar_lea.vmem %s2346_s5, %s1641_s17  ;;  %s2350_s5 = sld [smem:[#allocation28_spill]] }
  0x32   : > { %s2065_s20 = scalar_lea.vmem %s2347_s7, %s1641_s17  ;;  %s1644_s7 = sshll.u32 %s2042_s23, 6 }
  0x33   : > { %s2082_s3 = scalar_lea.vmem %s2349_s11, %s1641_s17  ;;  %s2096_s18 = scalar_lea.vmem %s2297_s13, %s1644_s7 }
  0x34   : > { %s2351_s11 = sld [smem:[#allocation29_spill]] }
  0x35   : > { %p1568_p0 = scmp.ne.s32.totalorder %s2352_s16, 0 }
  0x36   : > { %s2353_s26 = sld [smem:[#allocation20_spill]] (!%p1568_p0) }
  0x37   : > { %s758_s4 = scalar_lea.vmem %s2350_s5, %s2042_s23  ;;  %766 = sbr.rel (%p1568_p0) target bundleno = 335 (0x14f), region = 92 }
  0x38   : > { %s2355_s24 = sld [smem:[#allocation22_spill]] (!%p1568_p0) }
  0x3a   : > { %s761_s10 = scalar_lea.vmem %s2351_s11, %s2042_s23  ;;  %s2354_s11 = sld [smem:[#allocation21_spill]] (!%p1568_p0) }
  0x3c   : > { %v767_v0 = vld [vmem:[%s714_s30] sm:$0xf]  ;;  %vm774_vm0 = vcmask 261120   ;;  %v1862_v6 = vmov 32.0  }
  0x3d   : > { %v769_v1 = vld [vmem:[%s2353_s26] sm:$0xf]  ;;  %v768_v2 = vunpack.c.l.bf16 %v767_v0  ;;  %1740 = vrcp.f32 %v1862_v6 }
  0x3e   : > { %v770_v3 = vunpack.c.l.bf16 %v769_v1  ;;  %v773_v25 = vld [vmem:[%s2355_s24] sm:$0x1] }
  0x3f   : > { %v807_v29 = vunpack.c.l.bf16 %v773_v25 }
  0x40   : > { %v771_v4 = vadd.f32 %v770_v3, %v768_v2  ;;  %v772_v23 = vld [vmem:[%s2354_s11] sm:$0x1] }
  0x41   : > { %v804_v27 = vunpack.c.l.bf16 %v772_v23  ;;  %v808_v33 = vperm.slane %v807_v29, 0 }
  0x42   : > { %v775_v5 = vsel %vm774_vm0, %v771_v4, 0.0 }
  0x43   : > { %776 = vadd.xlane.f32.xlu0 %v775_v5  ;;  %v1741_v7 = vpop.eup %1740  ;;  %v805_v31 = vperm.slane %v804_v27, 0 }
  0x44   : > { %v779_v8 = vmul.f32 32.0, %v1741_v7  ;;  %vm783_vm1 = vweird.f32 %v1741_v7 }
  0x46   : > { %v780_v9 = vsub.f32 1.0, %v779_v8 }
  0x48   : > { %v781_v10 = vmul.f32 %v1741_v7, %v780_v9 }
  0x4a   : > { %v782_v11 = vadd.f32 %v1741_v7, %v781_v10 }
  0x4c   : > { %v784_v12 = vsel %vm783_vm1, %v1741_v7, %v782_v11 }
  0xb6   : > { %v777_v13 = vpop.xlane.xlu0 %776 }
  0xb7   : > { %v785_v14 = vmul.f32 %v784_v12, %v777_v13 }
  0xb9   : > { %v786_v15 = vsub.f32 %v771_v4, %v785_v14 }
  0xbb   : > { %v787_v16 = vmul.f32 %v786_v15, %v786_v15 }
  0xbd   : > { %v788_v17 = vsel %vm774_vm0, %v787_v16, 0.0 }
  0xbe   : > { %789 = vadd.xlane.f32.xlu0 %v788_v17 }
 0x131   : > { %v790_v18 = vpop.xlane.xlu0 %789 }
 0x132   : > { %v791_v19 = vmul.f32 %v790_v18, %v784_v12 }
 0x134   : > { %v792_v20 = vadd.f32 1e-05, %v791_v19 }
 0x136   : > { %1742 = vrsqrt.f32 %v792_v20  ;;  %vm799_vm3 = vweird.f32 %v792_v20 }
 0x13c   : > { %v1743_v21 = vpop.eup %1742 }
 0x13d   : > { %v794_v22 = vmul.f32 %v1743_v21, %v792_v20  ;;  %vm800_vm2 = vweird.f32 %v1743_v21 }
 0x13e   : > { %vm801_vm4 = vmor %vm799_vm3, %vm800_vm2 }
 0x13f   : > { %v795_v24 = vmul.f32 %v1743_v21, %v794_v22 }
 0x141   : > { %v796_v26 = vmul.f32 0.5, %v795_v24 }
 0x143   : > { %v797_v28 = vsub.f32 1.5, %v796_v26 }
 0x145   : > { %v798_v30 = vmul.f32 %v1743_v21, %v797_v28 }
 0x147   : > { %v802_v32 = vsel %vm801_vm4, %v1743_v21, %v798_v30 }
 0x148   : > { %v803_v34 = vmul.f32 %v802_v32, %v786_v15 }
 0x14a   : > { %v806_v35 = vmul.f32 %v805_v31, %v803_v34 }
 0x14c   : > { %v809_v36 = vadd.f32 %v808_v33, %v806_v35 }
 0x14e   : > { %810 = vst.msk [vmem:[#allocation2] sm:$0xff] %vm774_vm0, %v809_v36 }
 0x14f PF: > { %v1646_v37 = vld [vmem:[%s2056_s28 + $0x8] sm:$0xff]  ;;  %v1645_v38 = vld [vmem:[%s2056_s28] sm:$0xff]  ;;  %vm832_vm5 = vcmask 261120   ;;  %s2356_s21 = scalar_lea.vmem %s2290_s6, %s2042_s23  ;;  %s1863_s28 = smov 104   ;;  %vm867_vm6 = vcmask 64512   ;;  %vm1009_vm7 = vcmask 1043456  }
 0x150   : > { %842 = vmatpush.bf16.msra.mxu0 %v1646_v37  ;;  %v817_v41 = vld [vmem:[%s2356_s21] sm:$0x1]  ;;  %s1864_s17 = smov 120   ;;  %s1865_s2 = smov 112   ;;  %vm1102_vm8 = vcmask 130048   ;;  %vm1104_vm9 = vcmask 195584  }
 0x151   : > { %v818_v42 = vunpack.c.l.bf16 %v817_v41  ;;  %s1866_s16 = smov 96   ;;  %s2357_s5 = sld [smem:[#allocation23_spill]] }
 0x152   : > { %s1868_s11 = smov 16   ;;  %s1869_s30 = smov 8  }
 0x153   : > { %v819_v43 = vperm.slane %v818_v42, 0  ;;  %s1870_s26 = smov 24   ;;  %s2359_s25 = scalar_lea.vmem %s2292_s8, %s2042_s23 }
 0x154   : > { %843 = vmatpush.bf16.msra.mxu0 %v1645_v38  ;;  %s2360_s21 = scalar_lea.vmem %s2293_s9, %s2042_s23 }
 0x155   : > { %v2122_v39 = vld [vmem:[#allocation2] sm:$0xff] }
 0x156   : > { %v812_v40 = vpack.c.bf16 %v2122_v39, %v2122_v39 }
 0x157   : > { %s2358_s7 = scalar_lea.vmem %s2357_s5, %s2039_s22  ;;  %s1867_s22 = smov 64  }
 0x158   : > { %1577 = vmatmul.msk.bf16.vlgmr.msra.gmra.mxu0 %vm832_vm5, %v812_v40  ;;  %v857_v5 = vld [vmem:[%s2358_s7] sm:$0x1] }
 0x159   : > { %v858_v6 = vsub.f32 1.0, %v857_v5 }
 0x15b   : > { %v859_v7 = vmul.f32 -1e+09, %v858_v6 }
 0x15d   : > { %v861_v8 = vperm.slane %v859_v7, 0 }
 0x1d5   : > { %v845_v44 = vpop.f32.mrf.mxu0 }
 0x1d6   : > { %v846_v45 = vadd.f32 %v845_v44, %v819_v43 }
 0x1d8   : > { %v849_v46 = vpack.c.bf16 %v846_v45, %v846_v45 }
 0x1da   : > { %855 = vrot.lane.b32.xlu1 %v849_v46, %s1863_s28  ;;  %851 = vrot.lane.b32.xlu0 %v849_v46, %s1864_s17  ;;  %v863_v48 = vunpack.c.l.b16 %v849_v46 }
 0x1dc   : > { %v2132_v49 = vpack.c.b16 %v863_v48, %v863_v48 }
 0x1dd   : > { %v847_v47 = vpop.f32.mrf.mxu0 }
 0x1e2   : > { %853 = vrot.lane.b32.xlu0 %v849_v46, %s1865_s2  ;;  %s2361_s2 = sld [smem:[#allocation26_spill]] }
 0x1ea   : > { %865 = vrot.lane.b32.xlu0 %v2132_v49, %s1866_s16 }
 0x24c   : > { %v852_v50 = vpop.permute.xlu0 %851  ;;  %v856_v56 = vpop.permute.xlu1 %855 }
 0x24d   : > { %v887_v51 = vunpack.c.l.b16 %v852_v50  ;;  %v933_v57 = vunpack.c.l.b16 %v856_v56 }
 0x24f   : > { %v2135_v52 = vpack.c.b16 %v887_v51, %v887_v51  ;;  %v934_v60 = vpack.c.b16 %v933_v57, %v933_v57 }
 0x251   : > { %889 = vrot.lane.b32.xlu1 %v2135_v52, %s1866_s16 }
 0x254   : > { %v854_v53 = vpop.permute.xlu0 %853 }
 0x255   : > { %v910_v54 = vunpack.c.l.b16 %v854_v53 }
 0x257   : > { %v2138_v55 = vpack.c.b16 %v910_v54, %v910_v54 }
 0x259   : > { %912 = vrot.lane.b32.xlu2 %v2138_v55, %s1866_s16 }
 0x25c   : > { %v866_v58 = vpop.permute.xlu0 %865 }
 0x25d   : > { %v872_v59 = vsel %vm867_vm6, %v866_v58, 0 }
 0x25e   : > { %881 = vmatpush.bf16.xpose.msra.mxu1 %v872_v59 }
 0x261   : > { %935 = vrot.lane.b32.xlu2 %v934_v60, %s1866_s16  ;;  %s2362_s16 = scalar_lea.vmem %s2361_s2, %s2042_s23 }
 0x265   : > { %1578 = vmatmul.msk.bf16.vlgmr.msra.gmra.mxu1 %vm867_vm6, %v849_v46 }
 0x2b3   : > { %v913_v61 = vpop.permute.xlu2 %912 }
 0x2b4   : > { %v918_v62 = vsel %vm867_vm6, %v913_v61, 0 }
 0x2b5   : > { %927 = vmatpush.bf16.xpose.msra.mxu3 %v918_v62 }
 0x2bb   : > { %v936_v63 = vpop.permute.xlu2 %935 }
 0x2bc   : > { %1580 = vmatmul.msk.bf16.vlgmr.msra.gmra.mxu3 %vm867_vm6, %v854_v53  ;;  %v941_v0 = vsel %vm867_vm6, %v936_v63, 0 }
 0x2bd   : > { %950 = vmatpush.bf16.xpose.msrb.mxu0 %v941_v0 }
 0x2c3   : > { %v890_v1 = vpop.permute.xlu1 %889 }
 0x2c4   : > { %1581 = vmatmul.msk.bf16.vlgmr.msrb.gmra.mxu0 %vm867_vm6, %v856_v56  ;;  %v895_v2 = vsel %vm867_vm6, %v890_v1, 0 }
 0x2c5   : > { %904 = vmatpush.bf16.xpose.msra.mxu2 %v895_v2 }
 0x2cc   : > { %1579 = vmatmul.msk.bf16.vlgmr.msra.gmra.mxu2 %vm867_vm6, %v852_v50 }
 0x2e2   : > { %v883_v3 = vpop.f32.mrf.mxu1 }
 0x2e3   : > { %v884_v15 = vadd.f32 %v883_v3, %v861_v8 }
 0x2e5   : > { %v956_v18 = vsel %vm867_vm6, %v884_v15, -inf }
 0x2ea   : > { %v885_v4 = vpop.f32.mrf.mxu1 }
 0x33f   : > { %v929_v9 = vpop.f32.mrf.mxu3 }
 0x340   : > { %v930_v10 = vadd.f32 %v929_v9, %v861_v8 }
 0x341   : > { %v952_v11 = vpop.f32.mrf.mxu0 }
 0x342   : > { %v953_v12 = vadd.f32 %v952_v11, %v861_v8  ;;  %v962_v13 = vsel %vm867_vm6, %v930_v10, -inf }
 0x343   : > { %963 = vmax.xlane.f32.xlu2 %v962_v13  ;;  %v1647_v13 = vld [vmem:[%s2065_s20] sm:$0xff] }
 0x344   : > { %v965_v14 = vsel %vm867_vm6, %v953_v12, -inf }
 0x345   : > { %966 = vmax.xlane.f32.xlu0 %v965_v14 }
 0x347   : > { %v931_v16 = vpop.f32.mrf.mxu3 }
 0x349   : > { %v954_v17 = vpop.f32.mrf.mxu0 }
 0x34b   : > { %957 = vmax.xlane.f32.xlu2 %v956_v18 }
 0x34f   : > { %v906_v19 = vpop.f32.mrf.mxu2 }
 0x350   : > { %v907_v20 = vadd.f32 %v906_v19, %v861_v8 }
 0x352   : > { %v959_v21 = vsel %vm867_vm6, %v907_v20, -inf }
 0x353   : > { %960 = vmax.xlane.f32.xlu1 %v959_v21  ;;  %v1111_v21 = vld [vmem:[%s2359_s25] sm:$0x1] }
 0x357   : > { %v908_v22 = vpop.f32.mrf.mxu2 }
 0x358   : > { %v1112_v22 = vunpack.c.l.bf16 %v1111_v21 }
 0x3b6   : > { %v964_v23 = vpop.xlane.xlu2 %963 }
 0x3b7   : > { %v970_v24 = vsub.f32 %v930_v10, %v964_v23  ;;  %v1113_v23 = vperm.slane %v1112_v22, 0 }
 0x3b8   : > { %v967_v25 = vpop.xlane.xlu0 %966 }
 0x3b9   : > { %v976_v26 = vmul.f32 1.442695, %v970_v24  ;;  %v971_v27 = vsub.f32 %v953_v12, %v967_v25  ;;  %v1648_v12 = vld [vmem:[%s2065_s20 + $0x8] sm:$0xff] }
 0x3bb   : > { %1744 = vpow2.f32 %v976_v26  ;;  %v978_v28 = vmul.f32 1.442695, %v971_v27 }
 0x3bd   : > { %1746 = vpow2.f32 %v978_v28 }
 0x3be   : > { %v958_v38 = vpop.xlane.xlu2 %957 }
 0x3bf   : > { %v968_v40 = vsub.f32 %v884_v15, %v958_v38 }
 0x3c1   : > { %v1745_v29 = vpop.eup %1744  ;;  %v972_v41 = vmul.f32 1.442695, %v968_v40 }
 0x3c2   : > { %v986_v30 = vsel %vm867_vm6, %v1745_v29, 0.0 }
 0x3c3   : > { %v1747_v31 = vpop.eup %1746  ;;  %987 = vadd.xlane.f32.xlu2 %v986_v30 }
 0x3c4   : > { %v989_v32 = vsel %vm867_vm6, %v1747_v31, 0.0 }
 0x3c5   : > { %990 = vadd.xlane.f32.xlu0 %v989_v32 }
 0x3c6   : > { %v961_v33 = vpop.xlane.xlu1 %960 }
 0x3c7   : > { %v969_v34 = vsub.f32 %v907_v20, %v961_v33 }
 0x3c9   : > { %v974_v35 = vmul.f32 1.442695, %v969_v34 }
 0x3cb   : > { %1748 = vpow2.f32 %v974_v35 }
 0x3cc   : > { %1750 = vpow2.f32 %v972_v41  ;;  %v1650_v41 = vld [vmem:[%s2082_s3 + $0x8] sm:$0xff] }
 0x3d1   : > { %v1749_v36 = vpop.eup %1748 }
 0x3d2   : > { %v983_v37 = vsel %vm867_vm6, %v1749_v36, 0.0  ;;  %v1751_v42 = vpop.eup %1750 }
 0x3d3   : > { %984 = vadd.xlane.f32.xlu1 %v983_v37  ;;  %v980_v43 = vsel %vm867_vm6, %v1751_v42, 0.0 }
 0x3d9   : > { %1068 = vrot.lane.b32.xlu0 %v934_v60, %s1867_s22 }
 0x3db   : > { %1047 = vrot.lane.b32.xlu2 %v2138_v55, %s1867_s22 }
 0x3e1   : > { %1004 = vrot.lane.b32.xlu0 %v2132_v49, %s1867_s22 }
 0x3ec   : > { %1026 = vrot.lane.b32.xlu1 %v2135_v52, %s1867_s22  ;;  %s2363_s22 = scalar_lea.vmem %s2298_s14, %s2042_s23 }
 0x416   : > { %981 = vadd.xlane.f32.xlu1 %v980_v43  ;;  %v1658_v43 = vld [vmem:[%s2096_s18 + $0x38] sm:$0xff] }
 0x436   : > { %v988_v44 = vpop.xlane.xlu2 %987 }
 0x437   : > { %1752 = vrcp.f32 %v988_v44 }
 0x438   : > { %v991_v47 = vpop.xlane.xlu0 %990 }
 0x439   : > { %1754 = vrcp.f32 %v991_v47 }
 0x43d   : > { %v1753_v45 = vpop.eup %1752 }
 0x43e   : > { %v998_v46 = vmul.f32 %v1753_v45, %v1745_v29  ;;  %v1048_v48 = vpop.permute.xlu2 %1047  ;;  %v1871_v29 = vmov 32.0  }
 0x43f   : > { %v1053_v50 = vsel %vm1009_vm7, %v1048_v48, 0  ;;  %v1755_v51 = vpop.eup %1754  ;;  %v1656_v48 = vld [vmem:[%s2096_s18 + $0x28] sm:$0xff] }
 0x440   : > { %1062 = vmatpush.bf16.msrb.mxu3 %v1053_v50  ;;  %v1002_v49 = vpack.c.bf16 %v998_v46, %v998_v46  ;;  %v999_v52 = vmul.f32 %v1755_v51, %v1747_v31  ;;  %v1657_v46 = vld [vmem:[%s2096_s18 + $0x30] sm:$0xff]  ;;  %v1655_v50 = vld [vmem:[%s2096_s18 + $0x20] sm:$0xff] }
 0x442   : > { %v1003_v55 = vpack.c.bf16 %v999_v52, %v999_v52  ;;  %v1654_v52 = vld [vmem:[%s2096_s18 + $0x18] sm:$0xff] }
 0x443   : > { %1584 = vmatmul.msk.bf16.vlgmr.msrb.gmra.mxu3 %vm867_vm6, %v1002_v49 }
 0x444   : > { %1285 = vmatpush.bf16.msra.mxu3 %v1658_v43 }
 0x446   : > { %v985_v56 = vpop.xlane.xlu1 %984 }
 0x447   : > { %1756 = vrcp.f32 %v985_v56 }
 0x448   : > { %1286 = vmatpush.bf16.msra.mxu3 %v1657_v46 }
 0x44b   : > { %v1069_v53 = vpop.permute.xlu0 %1068 }
 0x44c   : > { %v1074_v54 = vsel %vm1009_vm7, %v1069_v53, 0  ;;  %1287 = vmatpush.bf16.msra.mxu3 %v1656_v48  ;;  %v1143_v53 = vld [vmem:[%s2360_s21] sm:$0x1] }
 0x44d   : > { %1083 = vmatpush.bf16.msra.mxu0 %v1074_v54  ;;  %v1757_v59 = vpop.eup %1756 }
 0x44e   : > { %v997_v60 = vmul.f32 %v1757_v59, %v1749_v36 }
 0x450   : > { %1585 = vmatmul.msk.bf16.vlgmr.msra.gmra.mxu0 %vm867_vm6, %v1003_v55  ;;  %v1001_v63 = vpack.c.bf16 %v997_v60, %v997_v60  ;;  %1288 = vmatpush.bf16.msra.mxu3 %v1655_v50  ;;  %v1144_v55 = vld [vmem:[%s2362_s16] sm:$0x1] }
 0x451   : > { %v1177_v60 = vunpack.c.l.bf16 %v1144_v55 }
 0x453   : > { %v1005_v57 = vpop.permute.xlu0 %1004 }
 0x454   : > { %v1011_v58 = vsel %vm1009_vm7, %v1005_v57, 0  ;;  %v1174_v57 = vunpack.c.l.bf16 %v1143_v53  ;;  %1289 = vmatpush.bf16.msra.mxu3 %v1654_v52 }
 0x455   : > { %1020 = vmatpush.bf16.msrb.mxu1 %v1011_v58  ;;  %v1653_v58 = vld [vmem:[%s2096_s18 + $0x10] sm:$0xff] }
 0x458   : > { %1290 = vmatpush.bf16.msra.mxu3 %v1653_v58 }
 0x459   : > { %1135 = vmatpush.bf16.msra.mxu1 %v1648_v12 }
 0x45d   : > { %1136 = vmatpush.bf16.msra.mxu1 %v1647_v13 }
 0x45e   : > { %v1027_v61 = vpop.permute.xlu1 %1026 }
 0x45f   : > { %v1032_v62 = vsel %vm1009_vm7, %v1027_v61, 0 }
 0x460   : > { %1041 = vmatpush.bf16.msrb.mxu2 %v1032_v62  ;;  %v1175_v62 = vperm.slane %v1174_v57, 0 }
 0x463   : > { %1583 = vmatmul.msk.bf16.vlgmr.msrb.gmra.mxu2 %vm867_vm6, %v1001_v63 }
 0x464   : > { %1209 = vmatpush.bf16.msra.mxu2 %v1650_v41 }
 0x489   : > { %v982_v0 = vpop.xlane.xlu1 %981 }
 0x48a   : > { %1758 = vrcp.f32 %v982_v0  ;;  %v1178_v0 = vperm.slane %v1177_v60, 0 }
 0x48b   : > { %1760 = vrcp.f32 %v1871_v29 }
 0x490   : > { %v1759_v1 = vpop.eup %1758 }
 0x491   : > { %v996_v2 = vmul.f32 %v1759_v1, %v1751_v42  ;;  %v1761_v30 = vpop.eup %1760  ;;  %v1649_v42 = vld [vmem:[%s2082_s3] sm:$0xff] }
 0x492   : > { %v1149_v31 = vmul.f32 32.0, %v1761_v30  ;;  %vm1153_vm10 = vweird.f32 %v1761_v30  ;;  %1210 = vmatpush.bf16.msra.mxu2 %v1649_v42 }
 0x493   : > { %v1000_v3 = vpack.c.bf16 %v996_v2, %v996_v2 }
 0x494   : > { %v1150_v32 = vsub.f32 1.0, %v1149_v31 }
 0x495   : > { %1582 = vmatmul.msk.bf16.vlgmr.msrb.gmra.mxu1 %vm867_vm6, %v1000_v3 }
 0x496   : > { %v1151_v33 = vmul.f32 %v1761_v30, %v1150_v32 }
 0x498   : > { %v1152_v34 = vadd.f32 %v1761_v30, %v1151_v33  ;;  %v1299_v33 = vld [vmem:[%s758_s4] sm:$0x1]  ;;  %s2366_s4 = sld [smem:[#allocation9_spill]] }
 0x49a   : > { %v2184_v35 = vsel %vm1153_vm10, %v1761_v30, %v1152_v34 }
 0x49e   : > { %p1636_p1 = scmp.ne.s32.totalorder %s2366_s4, 1 }
 0x4c6   : > { %v1064_v4 = vpop.f32.mrf.mxu3 }
 0x4c7   : > { %1094 = vrot.lane.b32.xlu0 %v1064_v4, %s1868_s11 }
 0x4cd   : > { %v1085_v5 = vpop.f32.mrf.mxu0 }
 0x4ce   : > { %v1066_v6 = vpop.f32.mrf.mxu3 }
 0x4cf   : > { %v1651_v6 = vld [vmem:[%s2096_s18] sm:$0xff] }
 0x4d5   : > { %v1087_v7 = vpop.f32.mrf.mxu0 }
 0x4d6   : > { %v1185_v7 = vld [vmem:[%s747_s27] sm:$0x1] }
 0x4e6   : > { %v1043_v8 = vpop.f32.mrf.mxu2 }
 0x4e7   : > { %1090 = vrot.lane.b32.xlu2 %v1043_v8, %s1869_s30  ;;  %v1186_v8 = vunpack.c.l.bf16 %v1185_v7 }
 0x4ee   : > { %v1045_v9 = vpop.f32.mrf.mxu2 }
 0x4ef   : > { %1098 = vrot.lane.b32.xlu2 %v1085_v5, %s1870_s26  ;;  %v1652_v5 = vld [vmem:[%s2096_s18 + $0x8] sm:$0xff]  ;;  %v1187_v9 = vperm.slane %v1186_v8, 0 }
 0x4f0   : > { %1291 = vmatpush.bf16.msra.mxu3 %v1652_v5 }
 0x4f4   : > { %1292 = vmatpush.bf16.msra.mxu3 %v1651_v6 }
 0x512   : > { %v1022_v10 = vpop.f32.mrf.mxu1 }
 0x51a   : > { %v1024_v11 = vpop.f32.mrf.mxu1 }
 0x539   : > { %v1095_v16 = vpop.permute.xlu0 %1094 }
 0x541   : > { %v1091_v14 = vpop.permute.xlu2 %1090 }
 0x542   : > { %v1101_v15 = vsel %vm867_vm6, %v1022_v10, %v1091_v14 }
 0x543   : > { %v1103_v18 = vsel %vm1102_vm8, %v1101_v15, %v1095_v16  ;;  %v1234_v15 = vld [vmem:[%s2363_s22] sm:$0x1] }
 0x544   : > { %v1235_v16 = vunpack.c.l.bf16 %v1234_v15 }
 0x549   : > { %v1099_v17 = vpop.permute.xlu2 %1098 }
 0x54a   : > { %v1105_v19 = vsel %vm1104_vm9, %v1103_v18, %v1099_v17  ;;  %v1236_v17 = vperm.slane %v1235_v16, 0 }
 0x54b   : > { %v1106_v20 = vpack.c.bf16 %v1105_v19, %v1105_v19 }
 0x54d   : > { %1594 = vmatmul.msk.bf16.vlgmr.msra.gmra.mxu1 %vm832_vm5, %v1106_v20 }
 0x5ca   : > { %v1138_v24 = vpop.f32.mrf.mxu1 }
 0x5cb   : > { %v1139_v25 = vadd.f32 %v1138_v24, %v1113_v23 }
 0x5cd   : > { %v1142_v26 = vadd.f32 %v1139_v25, %v2122_v39 }
 0x5cf   : > { %v1145_v27 = vsel %vm832_vm5, %v1142_v26, 0.0 }
 0x5d0   : > { %1146 = vadd.xlane.f32.xlu0 %v1145_v27 }
 0x5d2   : > { %v1140_v28 = vpop.f32.mrf.mxu1 }
 0x643   : > { %v1147_v36 = vpop.xlane.xlu0 %1146 }
 0x644   : > { %v1155_v39 = vmul.f32 %v2184_v35, %v1147_v36  ;;  %v1300_v36 = vld [vmem:[%s761_s10] sm:$0x1] }
 0x646   : > { %v1156_v37 = vsub.f32 %v1142_v26, %v1155_v39 }
 0x648   : > { %v1157_v38 = vmul.f32 %v1156_v37, %v1156_v37 }
 0x64a   : > { %v1158_v40 = vsel %vm832_vm5, %v1157_v38, 0.0 }
 0x64b   : > { %1159 = vadd.xlane.f32.xlu2 %v1158_v40 }
 0x6be   : > { %v1160_v44 = vpop.xlane.xlu2 %1159 }
 0x6bf   : > { %v1161_v45 = vmul.f32 %v1160_v44, %v2184_v35 }
 0x6c1   : > { %v1162_v47 = vadd.f32 1e-05, %v1161_v45 }
 0x6c3   : > { %1762 = vrsqrt.f32 %v1162_v47  ;;  %vm1169_vm12 = vweird.f32 %v1162_v47 }
 0x6c9   : > { %v1763_v49 = vpop.eup %1762 }
 0x6ca   : > { %v1164_v51 = vmul.f32 %v1763_v49, %v1162_v47  ;;  %vm1170_vm11 = vweird.f32 %v1763_v49 }
 0x6cb   : > { %vm1171_vm13 = vmor %vm1169_vm12, %vm1170_vm11 }
 0x6cc   : > { %v1165_v54 = vmul.f32 %v1763_v49, %v1164_v51 }
 0x6ce   : > { %v1166_v56 = vmul.f32 0.5, %v1165_v54 }
 0x6d0   : > { %v1167_v59 = vsub.f32 1.5, %v1166_v56 }
 0x6d2   : > { %v1168_v61 = vmul.f32 %v1763_v49, %v1167_v59 }
 0x6d4   : > { %v1172_v63 = vsel %vm1171_vm13, %v1763_v49, %v1168_v61 }
 0x6d5   : > { %v1173_v1 = vmul.f32 %v1172_v63, %v1156_v37  ;;  %v1323_v37 = vunpack.c.l.bf16 %v1299_v33 }
 0x6d7   : > { %v1176_v2 = vmul.f32 %v1175_v62, %v1173_v1  ;;  %v1324_v41 = vperm.slane %v1323_v37, 0 }
 0x6d9   : > { %v1179_v3 = vadd.f32 %v1178_v0, %v1176_v2 }
 0x6db   : > { %v1180_v4 = vpack.c.bf16 %v1179_v3, %v1179_v3 }
 0x6dd   : > { %1603 = vmatmul.msk.bf16.vlgmr.msra.gmra.mxu2 %vm832_vm5, %v1180_v4 }
 0x760   : > { %v1212_v10 = vpop.f32.mrf.mxu2 }
 0x761   : > { %v1213_v11 = vadd.f32 %v1212_v10, %v1187_v9 }
 0x763   : > { %v1216_v12 = vmax.f32 %v1213_v11, 0.0 }
 0x765   : > { %v1217_v13 = vpack.c.bf16 %v1216_v12, %v1216_v12 }
 0x767   : > { %1293 = vmatmul.bf16.vlgmr.msra.gmra.mxu3 %v1217_v13 }
 0x768   : > { %v1214_v14 = vpop.f32.mrf.mxu2 }
 0x7ea   : > { %v1294_v18 = vpop.f32.mrf.mxu3 }
 0x7eb   : > { %v1295_v19 = vadd.f32 %v1294_v18, %v1236_v17 }
 0x7ed   : > { %v1298_v20 = vadd.f32 %v1295_v19, %v1179_v3 }
 0x7ef   : > { %v1301_v21 = vsel %vm832_vm5, %v1298_v20, 0.0 }
 0x7f0   : > { %1302 = vadd.xlane.f32.xlu1 %v1301_v21 }
 0x7f2   : > { %v1296_v22 = vpop.f32.mrf.mxu3 }
 0x863   : > { %v1303_v23 = vpop.xlane.xlu1 %1302 }
 0x864   : > { %v1304_v24 = vmul.f32 %v1303_v23, %v2184_v35 }
 0x866   : > { %v1305_v25 = vsub.f32 %v1298_v20, %v1304_v24 }
 0x868   : > { %v1306_v26 = vmul.f32 %v1305_v25, %v1305_v25 }
 0x86a   : > { %v1307_v27 = vsel %vm832_vm5, %v1306_v26, 0.0 }
 0x86b   : > { %1308 = vadd.xlane.f32.xlu1 %v1307_v27 }
 0x8de   : > { %v1309_v28 = vpop.xlane.xlu1 %1308 }
 0x8df   : > { %v1310_v29 = vmul.f32 %v1309_v28, %v2184_v35  ;;  %v1326_v35 = vunpack.c.l.bf16 %v1300_v36 }
 0x8e1   : > { %v1311_v30 = vadd.f32 1e-05, %v1310_v29  ;;  %v1327_v43 = vperm.slane %v1326_v35, 0 }
 0x8e3   : > { %1764 = vrsqrt.f32 %v1311_v30  ;;  %vm1318_vm15 = vweird.f32 %v1311_v30 }
 0x8e9   : > { %v1765_v31 = vpop.eup %1764 }
 0x8ea   : > { %v1313_v32 = vmul.f32 %v1765_v31, %v1311_v30  ;;  %vm1319_vm14 = vweird.f32 %v1765_v31 }
 0x8eb   : > { %vm1320_vm0 = vmor %vm1318_vm15, %vm1319_vm14 }
 0x8ec   : > { %v1314_v34 = vmul.f32 %v1765_v31, %v1313_v32 }
 0x8ee   : > { %v1315_v39 = vmul.f32 0.5, %v1314_v34 }
 0x8f0   : > { %v1316_v38 = vsub.f32 1.5, %v1315_v39 }
 0x8f2   : > { %v1317_v40 = vmul.f32 %v1765_v31, %v1316_v38 }
 0x8f4   : > { %v1321_v42 = vsel %vm1320_vm0, %v1765_v31, %v1317_v40 }
 0x8f5   : > { %v1322_v44 = vmul.f32 %v1321_v42, %v1305_v25 }
 0x8f7   : > { %v1325_v45 = vmul.f32 %v1324_v41, %v1322_v44  ;;  %1333 = sbr.rel (%p1636_p1) target bundleno = 2310 (0x906), region = 96 }
 0x8f9   : > { %v1328_v46 = vadd.f32 %v1327_v43, %v1325_v45 }
 0x8fb   : > { %1329 = vst.msk [vmem:[#allocation2] sm:$0xff] %vm832_vm5, %v1328_v46 }
 0x8fc   : > { %vm1336_vm1 = vcmask 257024  }
 0x902   : > { %v1334_v47 = vld [vmem:[#allocation2] sm:$0xff] }
 0x903   : > { %v1335_v48 = vpack.c.bf16 %v1334_v47, %v1334_v47 }
 0x905   : > { %1337 = vst.msk [vmem:[%s710_s15] sm:$0xf] %vm1336_vm1, %v1335_v48 }
 0x906 PF: > { %s2367_s10 = sld [smem:[#allocation10_spill]]  ;;  %s1351_s17 = sshll.u32 %s710_s15, 4  ;;  %s1352_s17 = int_to_ptr.vmem [resolvable:$true] %s1351_s17 }
 0x907   : > { %s2368_s23 = sld [smem:[#allocation7_spill]] }
 0x908   : > { %s2370_s21 = sld [smem:[#allocation30_spill]] }
 0x90c   : > { %s1638_s25 = sshll.u32 %s2367_s10, 2 }
 0x90d   : > { %s2371_s16 = sand.u32 1, %s2368_s23  }
 0x90e   : > { %s1349_s28 = scalar_lea.hbm %s2370_s21, %s1638_s25  ;;  %s1339_s0 = scalar_lea.sflag [#allocation4], %s2371_s16 }
 0x90f   : > { %s1353_s2 = sshll.u32 %s1349_s28, 4  ;;  %s1786_s27 = scalar_lea.hbm %s2370_s21, 8  ;;  %s1354_s2 = int_to_ptr.hbm [resolvable:$true] %s1353_s2 }
 0x910   : > { %s1780_s19 = sshra.s32 %s1354_s2, 4  ;;  %s1781_s19 = int_to_ptr.hbm [resolvable:$true] %s1780_s19 }
 0x911   : > { %s1782_s5 = scalar_lea.hbm %s1781_s19, 4  ;;  %p1787_p6 = scmp.lt.s32.totalorder %s1781_s19, %s2370_s21 }
 0x912   : > { %p1783_p2 = scmp.ne.s32.totalorder %s1781_s19, %s1782_s5  ;;  %p1788_p7 = scmp.lt.s32.totalorder %s1786_s27, %s1782_s5 }
 0x914   : > { %p1784_p4 = pnand %p1783_p2, %p2011_p3  ;;  %p1789_p8 = por %p1788_p7, %p1787_p6 }
 0x916   : > { %p1785_p5 = pneg %p1784_p4 }
 0x918   : > { %p1790_p10 = pnand %p1789_p8, %p1785_p5 }
 0x91a   : > { %1793 = shalt.err (!%p1790_p10)
}
 0x91b   : > { %1659 = dma.vmem_to_hbm [thread:$0]  (%p2011_p3), %s1352_s17, 64, %s1354_s2, %s1339_s0  }
 0x91c PF: > { %s2372_s29 = sld [smem:[#allocation13_spill]] }
 0x91d   : > { %s2373_s15 = sld [smem:[#allocation6_spill]] }
 0x922   : > { %p1665_p11 = scmp.ge.s32.totalorder %s2372_s29, 2 }
 0x923   : > { %s1365_s26 = sand.u32 1, %s2373_s15  }
 0x924   : > { %p1662_p12 = pnand %p1665_p11, %p2021_p9  ;;  %s1366_s24 = scalar_lea.sflag [#allocation4], %s1365_s26 }
 0x926   : > { %p1663_p13 = pneg %p1662_p12 }
 0x928   : > { %1827 = dma.done.wait (%p1663_p13), %s1366_s24, 64  }
 0x929   : > { %1829 = vsyncadd (%p1663_p13), %s1366_s24, 4294967232  ;;  %s30_s30 = sadd.s32 1, %s2372_s29   ;;  %s2375_s24 = sld [smem:[#allocation7_spill]] }
 0x92a   : > { %p27_p0 = scmp.ge.s32.totalorder %s30_s30, 6   ;;  %s2376_s25 = sld [smem:[#allocation8_spill]] }
 0x92b   : > { %s2377_s26 = sld [smem:[#allocation18_spill]] }
 0x92c   : > { %s2378_s27 = sld [smem:[#allocation11_spill]]  ;;  %29 = sbr.rel (!%p27_p0) target bundleno = 18 (0x12), region = 170 }
 0x92d   : > { %s2379_s28 = sld [smem:[#allocation12_spill]] }
 0x92e   : > { %s2380_s29 = sld [smem:[#allocation14_spill]] }
 0x92f   : > { %s2381_s0 = sld [smem:[#allocation16_spill]] }
 0x931   :  { %1372 = vsyncpa [#allocation4], 1 }
 0x932   :  { %1374 = vsyncpa [#allocation4 + $0x1], 1 }

</bundles_post_ra>
